<compile_context>
chip_gen: v7x
topology: tpu7x:2x2x1
jax: 0.10.0
libtpu: 0.0.40
codegen_flags: <defaults>
</compile_context>

<pallas_src>
import functools

import jax
import jax.numpy as jnp
from jax.experimental import pallas as pl
from jax.experimental.pallas import tpu as pltpu


# Synthetic channel sizes (mocked nets in the source test).
C_IN = 4
C_BASE = 32
C_PIF = 16
C_PAF = 24
C_PAF_DENSE = 24
C_HEADS = C_PIF + C_PAF + C_PAF_DENSE       # 64 (multiple of 8 -> no padding)


def _round_up(x, m):
    return ((x + m - 1) // m) * m


# ----------------------------------------------------------------------------
# Fused Pallas kernel: base 1x1 conv (+bias, ReLU) then all head 1x1 convs
# (+bias), channel-major so both input loads and output stores are lane-dense.
#   x_ref: (C_IN, tm)   o_ref: (C_HEADS, tm)
# ----------------------------------------------------------------------------
def _fused_shell_kernel(x_ref, wb_ref, bb_ref, wh_ref, bh_ref, o_ref):
    x = x_ref[...].astype(jnp.float32)          # (C_IN, tm)
    wb = wb_ref[...]                            # (C_BASE, C_IN)

    # K=4 contraction done on the (otherwise idle) VPU as unrolled
    # broadcast-FMAs; avoids a second MXU push/drain for ~3% of the FLOPs.
    feats = wb[:, 0:1] * x[0:1, :]              # (C_BASE, tm)
    for k in range(1, C_IN):
        feats = feats + wb[:, k:k + 1] * x[k:k + 1, :]
    feats = jnp.maximum(feats + bb_ref[...], 0.0)

    # Head 1x1 convs on the MXU, f32 accumulation; cast only at the store so a
    # bf16 output dtype halves writeback without touching the VPU math.
    out = jnp.dot(wh_ref[...], feats, preferred_element_type=jnp.float32)
    o_ref[...] = (out + bh_ref[...]).astype(o_ref.dtype)


def fused_base_and_heads(chunks, params, *, tm=8192, out_dtype=None):
    """chunks: list of (C_IN, m_i) channel-major activations (one per pass).

    Returns (C_HEADS, m_pad) = concat(pif, paf, paf_dense) heads applied to
    relu(base conv) for all passes, computed in a single pallas_call.  Only
    the first sum(m_i) columns are meaningful; callers slice exact ranges.
    """
    cin = chunks[0].shape[0]
    dtype = chunks[0].dtype
    if out_dtype is None:
        out_dtype = dtype
    m = sum(int(c.shape[1]) for c in chunks)

    # Cap the tile at the (padded) problem size; keep it a multiple of 512
    # lanes so blocks stay (8,128)-aligned.  tm=8192 f32 output block is
    # 2 MiB (4 MiB double-buffered) -- safe for v5e/v6e/v7x scoped VMEM.
    # TODO(synk): on v7x, keep the grid >= ~8 blocks (shrink tm for mid-size
    # inputs) so the "parallel" axis load-balances across both TensorCores.
    tm_eff = min(tm, _round_up(m, 512))
    m_pad = _round_up(m, tm_eff)
    if m_pad != m:
        # Fold row padding into the concat instead of jnp.pad on the full array.
        chunks = list(chunks) + [jnp.zeros((cin, m_pad - m), dtype)]
    x_cm = jnp.concatenate(chunks, axis=1)      # (C_IN, m_pad)

    wb = params["base_w"]                       # (C_BASE, C_IN)
    bb = params["base_b"].reshape(C_BASE, 1)
    wh = params["heads_w"]                      # (C_HEADS, C_BASE)
    bh = params["heads_b"].reshape(C_HEADS, 1)

    # TODO(synk): C_IN=4 only fills 4 of 8 f32 sublanes on the input stream;
    # acceptable here (input bytes << output bytes), pack to 8 if C_IN grows.
    out = pl.pallas_call(
        _fused_shell_kernel,
        out_shape=jax.ShapeDtypeStruct((C_HEADS, m_pad), out_dtype),
        grid_spec=pltpu.PrefetchScalarGridSpec(
            num_scalar_prefetch=0,
            grid=(m_pad // tm_eff,),
            in_specs=[
                pl.BlockSpec((cin, tm_eff), lambda i: (0, i)),       # activations
                pl.BlockSpec((C_BASE, cin), lambda i: (0, 0)),       # base weight
                pl.BlockSpec((C_BASE, 1), lambda i: (0, 0)),         # base bias
                pl.BlockSpec((C_HEADS, C_BASE), lambda i: (0, 0)),   # head weights
                pl.BlockSpec((C_HEADS, 1), lambda i: (0, 0)),        # head biases
            ],
            out_specs=pl.BlockSpec((C_HEADS, tm_eff), lambda i: (0, i)),
        ),
        compiler_params=pltpu.CompilerParams(
            dimension_semantics=("parallel",)),
    )(x_cm, wb, bb, wh, bh)

    return out   # padded tail columns are never read by the caller


# ----------------------------------------------------------------------------
# Multiscale reduction / flip preprocessing (channel-major, hoisted transpose)
# ----------------------------------------------------------------------------
def _reduce_pass(x_cnhw, reduction, hflip):
    c, n, h, w = x_cnhw.shape
    if reduction == 1.5:
        # keep indices i where i % 3 != 2 (2-out-of-3 subsampling)
        y_idx = jnp.array([i for i in range(h) if i % 3 != 2], jnp.int32)
        x_idx = jnp.array([i for i in range(w) if i % 3 != 2], jnp.int32)
        red = x_cnhw[:, :, y_idx, :]
        red = red[:, :, :, x_idx]
    else:
        red = x_cnhw[:, :, ::reduction, ::reduction]
    if hflip:
        red = jnp.flip(red, axis=3)
    return red


def _hflip_head(*fields):
    # Undo horizontal flip on the field maps: flip the spatial W axis back.
    # TODO(synk): real PifHFlip/PafHFlip also swap keypoint channels per the
    # dataset HFLIP constants and negate x-offset regressions; that metadata is
    # mocked in the source file, so only the spatial flip is reproduced here.
    return tuple(jnp.flip(f, axis=3) for f in fields)


# ----------------------------------------------------------------------------
# ShellMultiScale forward
# ----------------------------------------------------------------------------
def shell_multiscale_forward(x_nchw, params, *, include_hflip=True,
                             reuse_hflip_identity=False, tm=8192,
                             out_dtype=None):
    """out_dtype=jnp.bfloat16 halves HBM writeback (accumulation stays f32)."""
    n, c, h, w = x_nchw.shape
    # Hoist the layout change once: NCHW -> channel-major (C, N, H, W).
    x_cnhw = jnp.transpose(x_nchw, (1, 0, 2, 3))

    # reuse_hflip_identity exploits that the mocked base/head nets are
    # pointwise 1x1 convs, so flip -> convs -> flip-back is an identity.  It
    # defaults to False so the faithful per-pass computation is performed.
    compute_hflip = include_hflip and not reuse_hflip_identity

    pass_shapes = []
    chunks = []
    for hflip in ([False, True] if compute_hflip else [False]):
        for reduction in (1, 1.5, 2, 3, 5):
            red = _reduce_pass(x_cnhw, reduction, hflip)
            _, _, hp, wp = red.shape
            pass_shapes.append((n, hp, wp))
            chunks.append(red.reshape(c, n * hp * wp))

    # One kernel launch for every pass and every head.
    heads_cm = fused_base_and_heads(chunks, params, tm=tm, out_dtype=out_dtype)

    # Split back into per-pass / per-head NCHW tensors with ONE re-layout per
    # pass (not per head).
    head_splits = ((0, C_PIF),
                   (C_PIF, C_PIF + C_PAF),
                   (C_PIF + C_PAF, C_HEADS))
    head_outputs = []
    m0 = 0
    for (nb, hp, wp) in pass_shapes:
        mp = nb * hp * wp
        blk = heads_cm[:, m0:m0 + mp].reshape(C_HEADS, nb, hp, wp)
        blk = jnp.transpose(blk, (1, 0, 2, 3))          # (N, C_HEADS, H, W)
        for c0, c1 in head_splits:
            head_outputs.append((blk[:, c0:c1],))       # composite heads = tuples
        m0 += mp

    if include_hflip:
        if reuse_hflip_identity:
            # corrected hflip outputs == non-flip outputs for pointwise mocks
            head_outputs = head_outputs + head_outputs[:15]
        else:
            for mscale_i in range(5, 10):
                head_i = mscale_i * 3
                for j in range(3):
                    head_outputs[head_i + j] = _hflip_head(*head_outputs[head_i + j])

    # process_heads is None in this synthetic setup
    return head_outputs


# ----------------------------------------------------------------------------
# Deterministic parameter construction (weights stored (Cout, Cin))
# ----------------------------------------------------------------------------
def make_params(c_in=C_IN):
    key = jax.random.PRNGKey(0)
    keys = jax.random.split(key, 4)

    def w(k, co, ci):
        return jax.random.normal(k, (co, ci), jnp.float32) * 0.1

    base_w = w(keys[0], C_BASE, c_in)
    pif_w = w(keys[1], C_PIF, C_BASE)
    paf_w = w(keys[2], C_PAF, C_BASE)
    paf_dense_w = w(keys[3], C_PAF_DENSE, C_BASE)

    heads_w = jnp.concatenate([pif_w, paf_w, paf_dense_w], axis=0)  # (64, 32)
    heads_b = jnp.zeros((C_HEADS,), jnp.float32)

    return {
        "base_w": base_w,
        "base_b": jnp.zeros((C_BASE,), jnp.float32),
        "heads_w": heads_w,
        "heads_b": heads_b,
    }


if __name__ == "__main__":
    key = jax.random.PRNGKey(0)
    x = jax.random.normal(key, (2, 4, 16, 16), jnp.float32)  # NCHW

    params = make_params(c_in=4)
    fwd = jax.jit(functools.partial(shell_multiscale_forward,
                                    include_hflip=True,
                                    reuse_hflip_identity=False))
    outputs = fwd(x, params)

    # 2 hflip passes x 5 reductions x 3 heads = 30 head outputs (each a tuple)
    assert len(outputs) == 30
    for tup in outputs:
        for t in tup:
            jax.block_until_ready(t)

    # Correctness: reduction=1, no-flip pass, all three heads vs pure-JAX ref.
    feats_ref = jnp.maximum(
        jnp.einsum("oc,nchw->nohw", params["base_w"], x)
        + params["base_b"][None, :, None, None], 0.0)
    heads_ref = (jnp.einsum("oc,nchw->nohw", params["heads_w"], feats_ref)
                 + params["heads_b"][None, :, None, None])
    refs = (heads_ref[:, :C_PIF],
            heads_ref[:, C_PIF:C_PIF + C_PAF],
            heads_ref[:, C_PIF + C_PAF:])
    for hi, ref in enumerate(refs):
        got = outputs[hi][0]
        # 1e-3 bounds any MXU pass-decomposition rounding while still catching
        # channel-ordering / layout bugs (which produce O(0.1..1) errors).
        assert jnp.allclose(got, ref, rtol=1e-3, atol=1e-3), \
            f"Pallas fused kernel mismatch vs JAX reference (head {hi})"

    # hflip-corrected reduction=1 pif head must equal the non-flip one
    # (pointwise nets => flip -> net -> flip-back is an identity).
    assert jnp.allclose(outputs[15][0], outputs[0][0], rtol=1e-5, atol=1e-5), \
        "hflip correction plumbing mismatch"

    # Exercise the bf16-output fast path (halves HBM writeback traffic).
    outputs_bf16 = jax.jit(functools.partial(shell_multiscale_forward,
                                             include_hflip=True,
                                             reuse_hflip_identity=False,
                                             out_dtype=jnp.bfloat16))(x, params)
    for tup in outputs_bf16:
        for t in tup:
            jax.block_until_ready(t)
    assert outputs_bf16[0][0].dtype == jnp.bfloat16

    print("KERNEL_OK")
</pallas_src>

<mosaic_0001>
module attributes {stable_mosaic.version = 11 : i64} {
  func.func @_fused_shell_kernel(%arg0: i32, %arg1: memref<4x2048xf32, #tpu.memory_space<vmem>>, %arg2: memref<32x4xf32, #tpu.memory_space<vmem>>, %arg3: memref<32x1xf32, #tpu.memory_space<vmem>>, %arg4: memref<64x32xf32, #tpu.memory_space<vmem>>, %arg5: memref<64x1xf32, #tpu.memory_space<vmem>>, %arg6: memref<64x2048xf32, #tpu.memory_space<vmem>>) attributes {dimension_semantics = [#tpu.dimension_semantics<parallel>], iteration_bounds = array<i64: 1>, scalar_prefetch = 0 : i64, scratch_operands = 0 : i64, tpu.core_type = #tpu.core_type<tc>, window_params = [{transform_indices = @transform_0, window_bounds = array<i64: 4, 2048>}, {pipeline_mode = #tpu.pipeline_mode<synchronous>, transform_indices = @transform_1, window_bounds = array<i64: 32, 4>}, {pipeline_mode = #tpu.pipeline_mode<synchronous>, transform_indices = @transform_2, window_bounds = array<i64: 32, 1>}, {pipeline_mode = #tpu.pipeline_mode<synchronous>, transform_indices = @transform_3, window_bounds = array<i64: 64, 32>}, {pipeline_mode = #tpu.pipeline_mode<synchronous>, transform_indices = @transform_4, window_bounds = array<i64: 64, 1>}, {transform_indices = @transform_5, window_bounds = array<i64: 64, 2048>}]} {
    %c0 = arith.constant 0 : index
    %c0_0 = arith.constant 0 : index
    %0 = vector.load %arg1[%c0, %c0_0] : memref<4x2048xf32, #tpu.memory_space<vmem>>, vector<4x2048xf32>
    %c0_1 = arith.constant 0 : index
    %c0_2 = arith.constant 0 : index
    %1 = vector.load %arg2[%c0_1, %c0_2] : memref<32x4xf32, #tpu.memory_space<vmem>>, vector<32x4xf32>
    %2 = vector.extract_strided_slice %1 {offsets = [0, 0], sizes = [32, 1], strides = [1, 1]} : vector<32x4xf32> to vector<32x1xf32>
    %3 = vector.extract_strided_slice %0 {offsets = [0, 0], sizes = [1, 2048], strides = [1, 1]} : vector<4x2048xf32> to vector<1x2048xf32>
    %4 = vector.broadcast %2 : vector<32x1xf32> to vector<32x2048xf32>
    %5 = vector.broadcast %3 : vector<1x2048xf32> to vector<32x2048xf32>
    %6 = arith.mulf %4, %5 : vector<32x2048xf32>
    %7 = vector.extract_strided_slice %1 {offsets = [0, 1], sizes = [32, 1], strides = [1, 1]} : vector<32x4xf32> to vector<32x1xf32>
    %8 = vector.extract_strided_slice %0 {offsets = [1, 0], sizes = [1, 2048], strides = [1, 1]} : vector<4x2048xf32> to vector<1x2048xf32>
    %9 = vector.broadcast %7 : vector<32x1xf32> to vector<32x2048xf32>
    %10 = vector.broadcast %8 : vector<1x2048xf32> to vector<32x2048xf32>
    %11 = arith.mulf %9, %10 : vector<32x2048xf32>
    %12 = arith.addf %6, %11 : vector<32x2048xf32>
    %13 = vector.extract_strided_slice %1 {offsets = [0, 2], sizes = [32, 1], strides = [1, 1]} : vector<32x4xf32> to vector<32x1xf32>
    %14 = vector.extract_strided_slice %0 {offsets = [2, 0], sizes = [1, 2048], strides = [1, 1]} : vector<4x2048xf32> to vector<1x2048xf32>
    %15 = vector.broadcast %13 : vector<32x1xf32> to vector<32x2048xf32>
    %16 = vector.broadcast %14 : vector<1x2048xf32> to vector<32x2048xf32>
    %17 = arith.mulf %15, %16 : vector<32x2048xf32>
    %18 = arith.addf %12, %17 : vector<32x2048xf32>
    %19 = vector.extract_strided_slice %1 {offsets = [0, 3], sizes = [32, 1], strides = [1, 1]} : vector<32x4xf32> to vector<32x1xf32>
    %20 = vector.extract_strided_slice %0 {offsets = [3, 0], sizes = [1, 2048], strides = [1, 1]} : vector<4x2048xf32> to vector<1x2048xf32>
    %21 = vector.broadcast %19 : vector<32x1xf32> to vector<32x2048xf32>
    %22 = vector.broadcast %20 : vector<1x2048xf32> to vector<32x2048xf32>
    %23 = arith.mulf %21, %22 : vector<32x2048xf32>
    %24 = arith.addf %18, %23 : vector<32x2048xf32>
    %c0_3 = arith.constant 0 : index
    %c0_4 = arith.constant 0 : index
    %25 = vector.load %arg3[%c0_3, %c0_4] : memref<32x1xf32, #tpu.memory_space<vmem>>, vector<32x1xf32>
    %26 = vector.broadcast %25 : vector<32x1xf32> to vector<32x2048xf32>
    %27 = arith.addf %24, %26 : vector<32x2048xf32>
    %cst = arith.constant 0.000000e+00 : f32
    %28 = vector.broadcast %cst : f32 to vector<32x2048xf32>
    %29 = arith.maximumf %27, %28 : vector<32x2048xf32>
    %c0_5 = arith.constant 0 : index
    %c0_6 = arith.constant 0 : index
    %30 = vector.load %arg4[%c0_5, %c0_6] : memref<64x32xf32, #tpu.memory_space<vmem>>, vector<64x32xf32>
    %cst_7 = arith.constant dense<0.000000e+00> : vector<64x2048xf32>
    %31 = tpu.matmul %30, %29, %cst_7 {dimension_numbers = #tpu.dot_dimension_numbers<[1], [0], [0], [1], [0, 0, 1, 1], [], []>} : vector<64x32xf32>, vector<32x2048xf32>, vector<64x2048xf32> -> vector<64x2048xf32>
    %c0_8 = arith.constant 0 : index
    %c0_9 = arith.constant 0 : index
    %32 = vector.load %arg5[%c0_8, %c0_9] : memref<64x1xf32, #tpu.memory_space<vmem>>, vector<64x1xf32>
    %33 = vector.broadcast %32 : vector<64x1xf32> to vector<64x2048xf32>
    %34 = arith.addf %31, %33 : vector<64x2048xf32>
    %c0_10 = arith.constant 0 : index
    %c0_11 = arith.constant 0 : index
    %35 = vector.load %arg6[%c0_10, %c0_11] : memref<64x2048xf32, #tpu.memory_space<vmem>>, vector<64x2048xf32>
    tpu.vector_store %arg6[%c0_10, %c0_11], %34 {strides = array<i32>} : memref<64x2048xf32, #tpu.memory_space<vmem>>, vector<64x2048xf32>,
    return
  }
  func.func @transform_0(%arg0: i32) -> (i32, i32) {
    %c0_i32 = arith.constant 0 : i32
    %c0_i32_0 = arith.constant 0 : i32
    return %c0_i32, %arg0 : i32, i32
  }
  func.func @transform_1(%arg0: i32) -> (i32, i32) {
    %c0_i32 = arith.constant 0 : i32
    %c0_i32_0 = arith.constant 0 : i32
    %c0_i32_1 = arith.constant 0 : i32
    return %c0_i32, %c0_i32_0 : i32, i32
  }
  func.func @transform_2(%arg0: i32) -> (i32, i32) {
    %c0_i32 = arith.constant 0 : i32
    %c0_i32_0 = arith.constant 0 : i32
    %c0_i32_1 = arith.constant 0 : i32
    return %c0_i32, %c0_i32_0 : i32, i32
  }
  func.func @transform_3(%arg0: i32) -> (i32, i32) {
    %c0_i32 = arith.constant 0 : i32
    %c0_i32_0 = arith.constant 0 : i32
    %c0_i32_1 = arith.constant 0 : i32
    return %c0_i32, %c0_i32_0 : i32, i32
  }
  func.func @transform_4(%arg0: i32) -> (i32, i32) {
    %c0_i32 = arith.constant 0 : i32
    %c0_i32_0 = arith.constant 0 : i32
    %c0_i32_1 = arith.constant 0 : i32
    return %c0_i32, %c0_i32_0 : i32, i32
  }
  func.func @transform_5(%arg0: i32) -> (i32, i32) {
    %c0_i32 = arith.constant 0 : i32
    %c0_i32_0 = arith.constant 0 : i32
    return %c0_i32, %arg0 : i32, i32
  }
}

</mosaic_0001>

<bundles_post_ra>
// kernel: shell_multiscale_forward.1
= control target key start
LH: loop header
LB: loop body
LE: loop exit
PB: predicated region body
PF: predicated region fallthrough
CT: control target
= control target key end

     0   :  { %v2548_v0 = vmov 3   ;;  %v2549_v1 = vmov 1   ;;  %v2550_v4 = vmov 2   ;;  %v2551_v7 = vmov 0   ;;  %s4525_s1 = inlined_call_operand.vmem [shape: f32[32,4], index: 1, kind: input, shape index: {}]   ;;  %s4526_s2 = inlined_call_operand.vmem [shape: f32[32,1], index: 2, kind: input, shape index: {}]   ;;  %s4527_s4 = inlined_call_operand.vmem [shape: f32[64,1], index: 4, kind: input, shape index: {}]   ;;  %s4528_s0 = inlined_call_operand.vmem [shape: f32[4,2048], index: 0, kind: input, shape index: {}]   ;;  %s4529_s3 = inlined_call_operand.vmem [shape: f32[64,32], index: 3, kind: input, shape index: {}]   ;;  %s4530_s5 = inlined_call_operand.vmem [shape: f32[64,2048], index: 5, kind: output, shape index: {}]  }
   0x1   :  { %2538 = vset.pattern.permute.xlu0 %v2548_v0  ;;  %2534 = vset.pattern.permute.xlu1 %v2549_v1  ;;  %v28_v2 = vld [vmem:[%s4525_s1] sm:$0xff]  ;;  %v29_v3 = vld [vmem:[%s4525_s1 + $0x8] sm:$0xff]  ;;  %v31_v5 = vld [vmem:[%s4525_s1 + $0x18] sm:$0xff]  ;;  %v4531_v19 = vmov 0.0   ;;  %v60_v21 = vlaneseq  ;;  %vm1340_vm0 = vcmask 261120  }
   0x2   :  { %845 = vperm.xlu0 %2538, %v28_v2   ;;  %269 = vperm.xlu1 %2534, %v28_v2   ;;  %v30_v6 = vld [vmem:[%s4525_s1 + $0x10] sm:$0xff]  ;;  %v1132_v8 = vld [vmem:[%s4526_s2] sm:$0xff]  ;;  %v1135_v9 = vld [vmem:[%s4526_s2 + $0x18] sm:$0xff] }
   0x3   :  { %v1293_v10 = vld [vmem:[%s4527_s4 + $0x8] sm:$0xff]  ;;  %v1295_v11 = vld [vmem:[%s4527_s4 + $0x18] sm:$0xff]  ;;  %v1134_v15 = vld [vmem:[%s4526_s2 + $0x10] sm:$0xff]  ;;  %1429 = vmatprep.mubr.f32.mxu0 %v4531_v19  ;;  %1542 = vmatprep.mubr.f32.mxu1 %v4531_v19  ;;  %v61_v22 = vshrl.u32 %v60_v21, 7 }
   0x4   :  { %v1297_v12 = vld [vmem:[%s4527_s4 + $0x28] sm:$0xff]  ;;  %v1299_v13 = vld [vmem:[%s4527_s4 + $0x38] sm:$0xff]  ;;  %v1292_v16 = vld [vmem:[%s4527_s4] sm:$0xff] }
   0x5   :  { %v1133_v14 = vld [vmem:[%s4526_s2 + $0x8] sm:$0xff]  ;;  %v1294_v17 = vld [vmem:[%s4527_s4 + $0x10] sm:$0xff]  ;;  %v1296_v18 = vld [vmem:[%s4527_s4 + $0x20] sm:$0xff]  ;;  %v2633_v23 = vsub.s32 5, %v61_v22  ;;  %v2638_v25 = vsub.s32 1, %v61_v22  ;;  %v2640_v26 = vsub.s32 6, %v61_v22 }
   0x6   :  { %2539 = vset.pattern.permute.xlu0 %v2550_v4  ;;  %273 = vperm.xlu1 %2534, %v29_v3   ;;  %v1298_v20 = vld [vmem:[%s4527_s4 + $0x30] sm:$0xff]  ;;  %v20_v24 = vld [vmem:[%s4528_s0] sm:$0xff]  ;;  %v2642_v27 = vsub.s32 2, %v61_v22  ;;  %v21_v28 = vld [vmem:[%s4528_s0 + $0x8] sm:$0xff]  ;;  %v2647_v29 = vsub.s32 4, %v61_v22  ;;  %v2654_v35 = vsub.s32 0, %v61_v22 }
   0x7   :  { %557 = vperm.xlu0 %2539, %v28_v2   ;;  %v291_v30 = vrot.slane %v20_v24, %v2633_v23  ;;  %v579_v31 = vrot.slane %v20_v24, %v2640_v26  ;;  %v299_v32 = vrot.slane %v21_v28, %v2633_v23  ;;  %v287_v33 = vrot.slane %v20_v24, %v2638_v25  ;;  %v2670_v43 = vld [vmem:[%s4528_s0 + $0x10] sm:$0xff]  ;;  %v23_v48 = vld [vmem:[%s4528_s0 + $0x18] sm:$0xff] }
   0x8   :  { %4606 = vst [vmem:[#allocation2_spill] sm:$0xff] %v2642_v27  ;;  %v295_v34 = vrot.slane %v21_v28, %v2638_v25  ;;  %4607 = vst [vmem:[#allocation3_spill] sm:$0xff] %v2654_v35  ;;  %v587_v36 = vrot.slane %v21_v28, %v2640_v26  ;;  %v575_v37 = vrot.slane %v20_v24, %v2642_v27  ;;  %v2663_v41 = vsub.s32 3, %v61_v22 }
   0x9   :  { %v67_v38 = vrot.slane %v20_v24, %v2647_v29  ;;  %v583_v39 = vrot.slane %v21_v28, %v2642_v27  ;;  %v2661_v40 = vrot.slane %v291_v30, %v2638_v25  ;;  %v2665_v42 = vsub.s32 7, %v61_v22 }
   0xa   :  { %2535 = vset.pattern.permute.xlu1 %v2550_v4  ;;  %4608 = vst [vmem:[#allocation4_spill] sm:$0xff] %v2663_v41  ;;  %v2673_v44 = vrot.slane %v579_v31, %v2642_v27  ;;  %v2676_v45 = vrot.slane %v299_v32, %v2638_v25  ;;  %v2679_v46 = vrot.slane %v287_v33, %v2638_v25 }
   0xb   :  { %569 = vperm.xlu0 %2539, %v31_v5   ;;  %561 = vperm.xlu1 %2535, %v29_v3   ;;  %4609 = vst [vmem:[#allocation5_spill] sm:$0xff] %v2665_v42  ;;  %v2682_v47 = vrot.slane %v295_v34, %v2638_v25  ;;  %v75_v49 = vrot.slane %v21_v28, %v2647_v29 }
   0xc   :  { %v2689_v50 = vrot.slane %v587_v36, %v2642_v27  ;;  %v63_v51 = vrot.slane %v20_v24, %v2654_v35  ;;  %v2693_v52 = vrot.slane %v575_v37, %v2642_v27  ;;  %v2696_v53 = vrot.slane %v67_v38, %v2654_v35 }
   0xd   :  { %v71_v54 = vrot.slane %v21_v28, %v2654_v35  ;;  %v2700_v55 = vrot.slane %v583_v39, %v2642_v27  ;;  %v307_v56 = vrot.slane %v2670_v43, %v2633_v23  ;;  %v867_v57 = vrot.slane %v20_v24, %v2665_v42 }
   0xe   :  { %v875_v58 = vrot.slane %v21_v28, %v2665_v42  ;;  %v863_v59 = vrot.slane %v20_v24, %v2663_v41  ;;  %v315_v60 = vrot.slane %v23_v48, %v2633_v23  ;;  %v871_v61 = vrot.slane %v21_v28, %v2663_v41  ;;  %v25_v24 = vld [vmem:[%s4528_s0 + $0x28] sm:$0xff] }
   0xf   :  { %2542 = vset.pattern.permute.xlu0 %v2551_v7  ;;  %2536 = vset.pattern.permute.xlu1 %v2551_v7  ;;  %v83_v62 = vrot.slane %v2670_v43, %v2647_v29  ;;  %v595_v63 = vrot.slane %v2670_v43, %v2640_v26  ;;  %v591_v21 = vrot.slane %v2670_v43, %v2642_v27 }
  0x10   :  { %34 = vperm.xlu0 %2542, %v28_v2   ;;  %44 = vperm.xlu1 %2536, %v30_v6   ;;  %v2719_v2 = vrot.slane %v63_v51, %v2654_v35  ;;  %v891_v31 = vrot.slane %v23_v48, %v2665_v42  ;;  %v87_v32 = vrot.slane %v23_v48, %v2654_v35 }
  0x11   :  { %v879_v33 = vrot.slane %v2670_v43, %v2663_v41  ;;  %v599_v34 = vrot.slane %v23_v48, %v2642_v27  ;;  %v887_v36 = vrot.slane %v23_v48, %v2663_v41 }
  0x14   :  { %39 = vperm.xlu0 %2542, %v29_v3   ;;  %2537 = vset.pattern.permute.xlu1 %v2549_v1  ;;  %v2716_v1 = vrot.slane %v75_v49, %v2654_v35  ;;  %v331_v49 = vrot.slane %v25_v24, %v2633_v23 }
  0x15   :  { %277 = vperm.xlu1 %2537, %v30_v6  }
  0x18   :  { %49 = vperm.xlu0 %2542, %v31_v5  }
  0x19   :  { %281 = vperm.xlu1 %2537, %v31_v5  }
  0x1c   :  { %1138 = vperm.xlu0 %2542, %v1132_v8   ;;  %v603_v8 = vrot.slane %v23_v48, %v2640_v26 }
  0x1d   :  { %2540 = vset.pattern.permute.xlu1 %v2548_v0 }
  0x1e   :  { %849 = vperm.xlu1 %2540, %v29_v3   ;;  %v91_v3 = vrot.slane %v23_v48, %v2647_v29  ;;  %v2776_v30 = vrot.slane %v603_v8, %v2642_v27 }
  0x20   :  { %1153 = vperm.xlu0 %2542, %v1135_v9   ;;  %v2733_v9 = vrot.slane %v867_v57, %v2663_v41  ;;  %4615 = vst [vmem:[#allocation11_spill] sm:$0xff] %v2776_v30  ;;  %v2798_v57 = vrot.slane %v891_v31, %v2663_v41 }
  0x22   :  { %2541 = vset.pattern.permute.xlu1 %v2550_v4  ;;  %v311_v4 = vrot.slane %v23_v48, %v2638_v25  ;;  %v619_v48 = vrot.slane %v25_v24, %v2640_v26  ;;  %4618 = vst [vmem:[#allocation14_spill] sm:$0xff] %v2798_v57 }
  0x23   :  { %565 = vperm.xlu1 %2541, %v30_v6  }
  0x24   :  { %1307 = vperm.xlu0 %2542, %v1293_v10   ;;  %v2736_v10 = vrot.slane %v875_v58, %v2663_v41  ;;  %v2767_v22 = vrot.slane %v311_v4, %v2638_v25  ;;  %v2801_v58 = vrot.slane %v87_v32, %v2654_v35  ;;  %v2836_v31 = vrot.slane %v619_v48, %v2642_v27 }
  0x25   :  { %v907_v32 = vrot.slane %v25_v24, %v2665_v42 }
  0x26   :  { %4614 = vst [vmem:[#allocation10_spill] sm:$0xff] %v2767_v22  ;;  %4619 = vst [vmem:[#allocation15_spill] sm:$0xff] %v2801_v58 }
  0x27   :  { %2543 = vset.pattern.permute.xlu1 %v2548_v0  ;;  %v303_v0 = vrot.slane %v2670_v43, %v2638_v25  ;;  %4629 = vst [vmem:[#allocation25_spill] sm:$0xff] %v2836_v31 }
  0x28   :  { %1317 = vperm.xlu0 %2542, %v1295_v11   ;;  %853 = vperm.xlu1 %2543, %v30_v6   ;;  %v2727_v6 = vrot.slane %v307_v56, %v2638_v25  ;;  %v2739_v11 = vrot.slane %v863_v59, %v2663_v41  ;;  %v2793_v56 = vrot.slane %v591_v21, %v2642_v27 }
  0x2a   :  { %4610 = vst [vmem:[#allocation6_spill] sm:$0xff] %v2727_v6  ;;  %4617 = vst [vmem:[#allocation13_spill] sm:$0xff] %v2793_v56 }
  0x2c   :  { %1327 = vperm.xlu0 %2542, %v1297_v12   ;;  %857 = vperm.xlu1 %2543, %v31_v5   ;;  %v2724_v5 = vrot.slane %v71_v54, %v2654_v35  ;;  %v2742_v12 = vrot.slane %v315_v60, %v2638_v25 }
  0x2e   :  { %4611 = vst [vmem:[#allocation7_spill] sm:$0xff] %v2742_v12 }
  0x30   :  { %1337 = vperm.xlu0 %2542, %v1299_v13   ;;  %2544 = vset.pattern.permute.xlu1 %v2551_v7  ;;  %v883_v7 = vrot.slane %v2670_v43, %v2665_v42  ;;  %v2745_v13 = vrot.slane %v871_v61, %v2663_v41  ;;  %v2806_v61 = vrot.slane %v879_v33, %v2663_v41 }
  0x31   :  { %1143 = vperm.xlu1 %2544, %v1133_v14   ;;  %v2748_v14 = vrot.slane %v83_v62, %v2654_v35  ;;  %v2809_v62 = vrot.slane %v599_v34, %v2642_v27  ;;  %v327_v33 = vrot.slane %v25_v24, %v2638_v25  ;;  %v27_v34 = vld [vmem:[%s4528_s0 + $0x38] sm:$0xff] }
  0x32   :  { %v2773_v28 = vrot.slane %v883_v7, %v2663_v41  ;;  %4620 = vst [vmem:[#allocation16_spill] sm:$0xff] %v2806_v61  ;;  %v2824_v7 = vrot.slane %v331_v49, %v2638_v25 }
  0x33   :  { %4621 = vst [vmem:[#allocation17_spill] sm:$0xff] %v2809_v62 }
  0x34   :  { %4626 = vst [vmem:[#allocation22_spill] sm:$0xff] %v2824_v7 }
  0x35   :  { %1148 = vperm.xlu1 %2544, %v1134_v15   ;;  %v2751_v15 = vrot.slane %v595_v63, %v2642_v27  ;;  %v2812_v63 = vrot.slane %v887_v36, %v2663_v41 }
  0x37   :  { %4612 = vst [vmem:[#allocation8_spill] sm:$0xff] %v2751_v15  ;;  %4622 = vst [vmem:[#allocation18_spill] sm:$0xff] %v2812_v63 }
  0x39   :  { %1302 = vperm.xlu1 %2544, %v1292_v16   ;;  %v2754_v16 = vrot.slane %v303_v0, %v2638_v25 }
  0x3b   :  { %4613 = vst [vmem:[#allocation9_spill] sm:$0xff] %v2754_v16 }
  0x3d   :  { %1312 = vperm.xlu1 %2544, %v1294_v17   ;;  %v24_v17 = vld [vmem:[%s4528_s0 + $0x20] sm:$0xff] }
  0x3e   :  { %v323_v37 = vrot.slane %v24_v17, %v2633_v23  ;;  %v99_v38 = vrot.slane %v24_v17, %v2647_v29  ;;  %v611_v39 = vrot.slane %v24_v17, %v2640_v26  ;;  %v319_v51 = vrot.slane %v24_v17, %v2638_v25 }
  0x3f   :  { %v899_v59 = vrot.slane %v24_v17, %v2665_v42  ;;  %v95_v60 = vrot.slane %v24_v17, %v2654_v35  ;;  %v895_v49 = vrot.slane %v24_v17, %v2663_v41 }
  0x40   :  { %v2815_v0 = vrot.slane %v323_v37, %v2638_v25  ;;  %v2821_v4 = vrot.slane %v611_v39, %v2642_v27  ;;  %v2827_v8 = vrot.slane %v319_v51, %v2638_v25  ;;  %v615_v39 = vrot.slane %v25_v24, %v2642_v27 }
  0x41   :  { %1322 = vperm.xlu1 %2544, %v1296_v18   ;;  %v2760_v18 = vrot.slane %v91_v3, %v2654_v35  ;;  %v2818_v3 = vrot.slane %v99_v38, %v2654_v35  ;;  %v2844_v36 = vrot.slane %v899_v59, %v2663_v41  ;;  %v2847_v37 = vrot.slane %v95_v60, %v2654_v35 }
  0x42   :  { %4623 = vst [vmem:[#allocation19_spill] sm:$0xff] %v2815_v0  ;;  %4625 = vst [vmem:[#allocation21_spill] sm:$0xff] %v2821_v4  ;;  %v607_v38 = vrot.slane %v24_v17, %v2642_v27  ;;  %v103_v51 = vrot.slane %v25_v24, %v2654_v35  ;;  %v2871_v58 = vrot.slane %v615_v39, %v2642_v27 }
  0x43   :  { %4624 = vst [vmem:[#allocation20_spill] sm:$0xff] %v2818_v3  ;;  %4627 = vst [vmem:[#allocation23_spill] sm:$0xff] %v2827_v8  ;;  %v347_v8 = vrot.slane %v27_v34, %v2633_v23 }
  0x44   :  { %4630 = vst [vmem:[#allocation26_spill] sm:$0xff] %v2844_v36  ;;  %4631 = vst [vmem:[#allocation27_spill] sm:$0xff] %v2847_v37  ;;  %v2860_v37 = vrot.slane %v907_v32, %v2663_v41  ;;  %v2868_v3 = vrot.slane %v607_v38, %v2642_v27  ;;  %v2876_v32 = vrot.slane %v895_v49, %v2663_v41 }
  0x45   :  { %1332 = vperm.xlu1 %2544, %v1298_v20   ;;  %v79_v20 = vrot.slane %v2670_v43, %v2654_v35  ;;  %v107_v43 = vrot.slane %v25_v24, %v2647_v29  ;;  %4635 = vst [vmem:[#allocation31_spill] sm:$0xff] %v2871_v58 }
  0x46   :  { %4632 = vst [vmem:[#allocation28_spill] sm:$0xff] %v2860_v37  ;;  %4634 = vst [vmem:[#allocation30_spill] sm:$0xff] %v2868_v3 }
  0x47   :  { %v2790_v54 = vrot.slane %v79_v20, %v2654_v35  ;;  %v26_v20 = vld [vmem:[%s4528_s0 + $0x30] sm:$0xff]  ;;  %v2833_v21 = vrot.slane %v107_v43, %v2654_v35  ;;  %v903_v43 = vrot.slane %v25_v24, %v2663_v41  ;;  %v343_v24 = vrot.slane %v27_v34, %v2638_v25  ;;  %4636 = vst [vmem:[#allocation32_spill] sm:$0xff] %v2876_v32 }
  0x48   :  { %v339_v48 = vrot.slane %v26_v20, %v2633_v23  ;;  %v115_v19 = vrot.slane %v26_v20, %v2647_v29  ;;  %v627_v59 = vrot.slane %v26_v20, %v2640_v26  ;;  %v335_v60 = vrot.slane %v26_v20, %v2638_v25 }
  0x49   :  { %4616 = vst [vmem:[#allocation12_spill] sm:$0xff] %v2790_v54  ;;  %4628 = vst [vmem:[#allocation24_spill] sm:$0xff] %v2833_v21  ;;  %v2863_v21 = vrot.slane %v327_v33, %v2638_v25  ;;  %v915_v17 = vrot.slane %v26_v20, %v2665_v42  ;;  %v123_v23 = vrot.slane %v27_v34, %v2647_v29 }
  0x4a   :  { %v635_v54 = vrot.slane %v27_v34, %v2640_v26  ;;  %v2879_v33 = vrot.slane %v103_v51, %v2654_v35  ;;  %v2882_v20 = vrot.slane %v903_v43, %v2663_v41  ;;  %v2885_v42 = vrot.slane %v339_v48, %v2638_v25 }
  0x4b   :  { %4633 = vst [vmem:[#allocation29_spill] sm:$0xff] %v2863_v21  ;;  %v2888_v38 = vrot.slane %v115_v19, %v2654_v35  ;;  %v2891_v39 = vrot.slane %v627_v59, %v2642_v27  ;;  %v2894_v26 = vrot.slane %v347_v8, %v2638_v25  ;;  %v2897_v29 = vrot.slane %v335_v60, %v2638_v25 }
  0x4c   :  { %4637 = vst [vmem:[#allocation33_spill] sm:$0xff] %v2879_v33  ;;  %4638 = vst [vmem:[#allocation34_spill] sm:$0xff] %v2882_v20  ;;  %v2904_v51 = vrot.slane %v915_v17, %v2663_v41  ;;  %v2907_v43 = vrot.slane %v123_v23, %v2654_v35  ;;  %v2910_v19 = vrot.slane %v635_v54, %v2642_v27 }
  0x4d   :  { %4639 = vst [vmem:[#allocation35_spill] sm:$0xff] %v2885_v42  ;;  %4640 = vst [vmem:[#allocation36_spill] sm:$0xff] %v2888_v38  ;;  %v2913_v48 = vrot.slane %v343_v24, %v2638_v25 }
  0x4e   :  { %4641 = vst [vmem:[#allocation37_spill] sm:$0xff] %v2891_v39  ;;  %4642 = vst [vmem:[#allocation38_spill] sm:$0xff] %v2894_v26 }
  0x4f   :  { %4643 = vst [vmem:[#allocation39_spill] sm:$0xff] %v2897_v29  ;;  %4646 = vst [vmem:[#allocation42_spill] sm:$0xff] %v2904_v51 }
  0x50   :  { %4647 = vst [vmem:[#allocation43_spill] sm:$0xff] %v2907_v43  ;;  %4648 = vst [vmem:[#allocation44_spill] sm:$0xff] %v2910_v19 }
  0x51   :  { %4649 = vst [vmem:[#allocation45_spill] sm:$0xff] %v2913_v48 }
  0x81   :  { %v2899_v34 = vpop.permute.xlu1 %269  ;;  %v2901_v49 = vpop.permute.xlu0 %845 }
  0x82   :  { %4644 = vst [vmem:[#allocation40_spill] sm:$0xff] %v2899_v34  ;;  %4645 = vst [vmem:[#allocation41_spill] sm:$0xff] %v2901_v49  ;;  %v2917_v8 = vmul.f32 %v2661_v40, %v2899_v34  ;;  %v2921_v59 = vmul.f32 %v2733_v9, %v2901_v49  ;;  %v2925_v60 = vmul.f32 %v2676_v45, %v2899_v34 }
  0x83   :  { %v2929_v17 = vmul.f32 %v2736_v10, %v2901_v49  ;;  %v2933_v25 = vmul.f32 %v2679_v46, %v2899_v34  ;;  %v2937_v54 = vmul.f32 %v2739_v11, %v2901_v49  ;;  %v2941_v24 = vmul.f32 %v2682_v47, %v2899_v34 }
  0x84   :  { %v2945_v23 = vmul.f32 %v2745_v13, %v2901_v49  ;;  %v2949_v48 = vmul.f32 %v2727_v6, %v2899_v34  ;;  %v2953_v27 = vmul.f32 %v2773_v28, %v2901_v49  ;;  %v2957_v29 = vmul.f32 %v2742_v12, %v2899_v34 }
  0x85   :  { %v2961_v41 = vmul.f32 %v2798_v57, %v2901_v49  ;;  %v2963_v35 = vpop.permute.xlu1 %273  ;;  %v2967_v19 = vmul.f32 %v2754_v16, %v2899_v34  ;;  %v2971_v26 = vmul.f32 %v2806_v61, %v2901_v49  ;;  %v2975_v43 = vmul.f32 %v2767_v22, %v2899_v34 }
  0x86   :  { %4650 = vst [vmem:[#allocation46_spill] sm:$0xff] %v2953_v27  ;;  %4651 = vst [vmem:[#allocation47_spill] sm:$0xff] %v2957_v29  ;;  %v2979_v51 = vmul.f32 %v2812_v63, %v2901_v49  ;;  %v2981_v39 = vpop.permute.xlu0 %557  ;;  %v2985_v42 = vmul.f32 %v2661_v40, %v2963_v35  ;;  %v2989_v38 = vmul.f32 %v2676_v45, %v2963_v35 }
  0x87   :  { %4652 = vst [vmem:[#allocation48_spill] sm:$0xff] %v2961_v41  ;;  %4653 = vst [vmem:[#allocation49_spill] sm:$0xff] %v2963_v35  ;;  %v2993_v20 = vmul.f32 %v2679_v46, %v2963_v35  ;;  %v2997_v58 = vmul.f32 %v2682_v47, %v2963_v35  ;;  %v717_v21 = vmul.f32 %v2673_v44, %v2981_v39 }
  0x88   :  { %4654 = vst [vmem:[#allocation50_spill] sm:$0xff] %v2967_v19  ;;  %4655 = vst [vmem:[#allocation51_spill] sm:$0xff] %v2971_v26  ;;  %v719_v33 = vmul.f32 %v2689_v50, %v2981_v39  ;;  %v716_v32 = vmul.f32 %v2693_v52, %v2981_v39  ;;  %v718_v3 = vmul.f32 %v2700_v55, %v2981_v39 }
  0x89   :  { %4656 = vst [vmem:[#allocation52_spill] sm:$0xff] %v2975_v43  ;;  %4657 = vst [vmem:[#allocation53_spill] sm:$0xff] %v2979_v51  ;;  %v3009_v37 = vmul.f32 %v2727_v6, %v2963_v35  ;;  %v3013_v51 = vmul.f32 %v2751_v15, %v2981_v39  ;;  %v3017_v63 = vmul.f32 %v2742_v12, %v2963_v35 }
  0x8a   :  { %4658 = vst [vmem:[#allocation54_spill] sm:$0xff] %v2981_v39  ;;  %v3021_v43 = vmul.f32 %v2776_v30, %v2981_v39  ;;  %v3025_v26 = vmul.f32 %v2754_v16, %v2963_v35  ;;  %v3029_v6 = vmul.f32 %v2793_v56, %v2981_v39  ;;  %v3033_v61 = vmul.f32 %v2767_v22, %v2963_v35  ;;  %v3039_v19 = vpop.permute.xlu1 %561  ;;  %v3041_v41 = vpop.permute.xlu0 %569 }
  0x8b   :  { %4659 = vst [vmem:[#allocation55_spill] sm:$0xff] %v3017_v63  ;;  %v3037_v12 = vmul.f32 %v2809_v62, %v2981_v39  ;;  %4665 = vst [vmem:[#allocation61_spill] sm:$0xff] %v3039_v19  ;;  %v3045_v16 = vmul.f32 %v2815_v0, %v2899_v34  ;;  %v3053_v22 = vmul.f32 %v2821_v4, %v2981_v39 }
  0x8c   :  { %4660 = vst [vmem:[#allocation56_spill] sm:$0xff] %v3021_v43  ;;  %4661 = vst [vmem:[#allocation57_spill] sm:$0xff] %v3025_v26  ;;  %v3049_v26 = vmul.f32 %v2815_v0, %v2963_v35  ;;  %v734_v0 = vmul.f32 %v2700_v55, %v3039_v19  ;;  %v3089_v43 = vmul.f32 %v2776_v30, %v3039_v19 }
  0x8d   :  { %4662 = vst [vmem:[#allocation58_spill] sm:$0xff] %v3029_v6  ;;  %4663 = vst [vmem:[#allocation59_spill] sm:$0xff] %v3033_v61  ;;  %v3057_v61 = vmul.f32 %v2844_v36, %v2901_v49  ;;  %v735_v6 = vmul.f32 %v2689_v50, %v3039_v19  ;;  %v3073_v49 = vmul.f32 %v2689_v50, %v3041_v41 }
  0x8e   :  { %4664 = vst [vmem:[#allocation60_spill] sm:$0xff] %v3037_v12  ;;  %4666 = vst [vmem:[#allocation62_spill] sm:$0xff] %v3041_v41  ;;  %v733_v12 = vmul.f32 %v2673_v44, %v3039_v19  ;;  %v3085_v36 = vmul.f32 %v2751_v15, %v3039_v19  ;;  %v3093_v57 = vmul.f32 %v2793_v56, %v3039_v19 }
  0x8f   :  { %4667 = vst [vmem:[#allocation63_spill] sm:$0xff] %v3045_v16  ;;  %4668 = vst [vmem:[#allocation64_spill] sm:$0xff] %v3049_v26  ;;  %v732_v16 = vmul.f32 %v2693_v52, %v3039_v19  ;;  %v3069_v26 = vmul.f32 %v2673_v44, %v3041_v41  ;;  %v3097_v63 = vmul.f32 %v2809_v62, %v3039_v19 }
  0x90   :  { %4669 = vst [vmem:[#allocation65_spill] sm:$0xff] %v3053_v22  ;;  %4670 = vst [vmem:[#allocation66_spill] sm:$0xff] %v3057_v61  ;;  %v3077_v61 = vmul.f32 %v2693_v52, %v3041_v41  ;;  %v3081_v22 = vmul.f32 %v2700_v55, %v3041_v41  ;;  %v3101_v29 = vmul.f32 %v2751_v15, %v3041_v41 }
  0x91   :  { %4672 = vst [vmem:[#allocation68_spill] sm:$0xff] %v3085_v36  ;;  %4673 = vst [vmem:[#allocation69_spill] sm:$0xff] %v3089_v43  ;;  %v3105_v27 = vmul.f32 %v2776_v30, %v3041_v41  ;;  %v3109_v36 = vmul.f32 %v2793_v56, %v3041_v41  ;;  %v3113_v43 = vmul.f32 %v2809_v62, %v3041_v41 }
  0x92   :  { %4671 = vst [vmem:[#allocation67_spill] sm:$0xff] %v3081_v22  ;;  %4674 = vst [vmem:[#allocation70_spill] sm:$0xff] %v3093_v57  ;;  %v3115_v57 = vpop.permute.xlu0 %34  ;;  %v3117_v22 = vpop.permute.xlu1 %44  ;;  %v3121_v15 = vmul.f32 %v2821_v4, %v3039_v19  ;;  %v3125_v30 = vmul.f32 %v2824_v7, %v2899_v34  ;;  %v3129_v56 = vmul.f32 %v2824_v7, %v2963_v35 }
  0x93   :  { %4675 = vst [vmem:[#allocation71_spill] sm:$0xff] %v3097_v63  ;;  %4676 = vst [vmem:[#allocation72_spill] sm:$0xff] %v3101_v29  ;;  %v3133_v41 = vmul.f32 %v2836_v31, %v2981_v39  ;;  %v207_v62 = vmul.f32 %v2716_v1, %v3115_v57  ;;  %v204_v4 = vmul.f32 %v2719_v2, %v3115_v57  ;;  %v4687_v29 = vld [vmem:[#allocation12_spill] sm:$0xff] }
  0x94   :  { %4677 = vst [vmem:[#allocation73_spill] sm:$0xff] %v3105_v27  ;;  %4678 = vst [vmem:[#allocation74_spill] sm:$0xff] %v3109_v36  ;;  %v206_v34 = vmul.f32 %v2724_v5, %v3115_v57  ;;  %v237_v7 = vmul.f32 %v2696_v53, %v3117_v22  ;;  %v239_v35 = vmul.f32 %v2716_v1, %v3117_v22 }
  0x95   :  { %4679 = vst [vmem:[#allocation75_spill] sm:$0xff] %v3113_v43  ;;  %4680 = vst [vmem:[#allocation76_spill] sm:$0xff] %v3115_v57  ;;  %v205_v43 = vmul.f32 %v2696_v53, %v3115_v57  ;;  %v236_v39 = vmul.f32 %v2719_v2, %v3117_v22  ;;  %v495_v31 = vadd.f32 %v2925_v60, %v207_v62  ;;  %v4689_v62 = vld [vmem:[#allocation15_spill] sm:$0xff] }
  0x96   :  { %4681 = vst [vmem:[#allocation77_spill] sm:$0xff] %v3117_v22  ;;  %4682 = vst [vmem:[#allocation78_spill] sm:$0xff] %v3121_v15  ;;  %v492_v19 = vadd.f32 %v2933_v25, %v204_v4  ;;  %v3157_v15 = vpop.permute.xlu0 %39  ;;  %v3161_v36 = vmul.f32 %v2748_v14, %v3115_v57  ;;  %v3165_v27 = vmul.f32 %v2760_v18, %v3115_v57  ;;  %v3175_v4 = vpop.permute.xlu1 %277 }
  0x97   :  { %4683 = vst [vmem:[#allocation79_spill] sm:$0xff] %v3125_v30  ;;  %4684 = vst [vmem:[#allocation80_spill] sm:$0xff] %v3129_v56  ;;  %v493_v56 = vadd.f32 %v2917_v8, %v205_v43  ;;  %v494_v30 = vadd.f32 %v2941_v24, %v206_v34  ;;  %v3169_v63 = vmul.f32 %v4687_v29, %v3115_v57 }
  0x98   :  { %4685 = vst [vmem:[#allocation81_spill] sm:$0xff] %v3133_v41  ;;  %v3151_v41 = vmul.f32 %v2724_v5, %v3117_v22  ;;  %4686 = vst [vmem:[#allocation82_spill] sm:$0xff] %v3165_v27  ;;  %v3173_v43 = vmul.f32 %v4689_v62, %v3115_v57  ;;  %v221_v34 = vmul.f32 %v2696_v53, %v3157_v15 }
  0x99   :  { %4688 = vst [vmem:[#allocation83_spill] sm:$0xff] %v3169_v63  ;;  %v781_v8 = vadd.f32 %v717_v21, %v493_v56  ;;  %v223_v60 = vmul.f32 %v2716_v1, %v3157_v15  ;;  %v783_v25 = vadd.f32 %v719_v33, %v495_v31  ;;  %v220_v24 = vmul.f32 %v2719_v2, %v3157_v15 }
  0x9a   :  { %4690 = vst [vmem:[#allocation84_spill] sm:$0xff] %v3173_v43  ;;  %v780_v22 = vadd.f32 %v716_v32, %v492_v19  ;;  %v222_v63 = vmul.f32 %v2724_v5, %v3157_v15  ;;  %v782_v29 = vadd.f32 %v718_v3, %v494_v30  ;;  %v509_v57 = vadd.f32 %v2985_v42, %v221_v34  ;;  %v3189_v21 = vpop.permute.xlu0 %49  ;;  %v3195_v27 = vpop.permute.xlu1 %281 }
  0x9b   :  { %v1069_v43 = vadd.f32 %v2921_v59, %v781_v8  ;;  %v511_v62 = vadd.f32 %v2989_v38, %v223_v60  ;;  %v1071_v56 = vadd.f32 %v2929_v17, %v783_v25  ;;  %v508_v31 = vadd.f32 %v2993_v20, %v220_v24 }
  0x9c   :  { %v1068_v33 = vadd.f32 %v2937_v54, %v780_v22  ;;  %v510_v32 = vadd.f32 %v2997_v58, %v222_v63  ;;  %v1070_v19 = vadd.f32 %v2945_v23, %v782_v29  ;;  %v797_v30 = vadd.f32 %v733_v12, %v509_v57 }
  0x9d   :  { %v799_v42 = vadd.f32 %v735_v6, %v511_v62  ;;  %v253_v3 = vmul.f32 %v2696_v53, %v3189_v21  ;;  %v461_v38 = vmul.f32 %v2661_v40, %v3175_v4  ;;  %v796_v59 = vadd.f32 %v732_v16, %v508_v31 }
  0x9e   :  { %v798_v17 = vadd.f32 %v734_v0, %v510_v32  ;;  %v477_v20 = vmul.f32 %v2661_v40, %v3195_v27  ;;  %v255_v22 = vmul.f32 %v2716_v1, %v3189_v21  ;;  %v463_v63 = vmul.f32 %v2676_v45, %v3175_v4  ;;  %v3211_v12 = vpop.permute.xlu0 %1138  ;;  %v3231_v29 = vpop.permute.xlu1 %849 }
  0x9f   :  { %v525_v58 = vadd.f32 %v461_v38, %v237_v7  ;;  %v479_v6 = vmul.f32 %v2676_v45, %v3195_v27  ;;  %v252_v53 = vmul.f32 %v2719_v2, %v3189_v21  ;;  %v460_v57 = vmul.f32 %v2679_v46, %v3175_v4 }
  0xa0   :  { %v541_v16 = vadd.f32 %v477_v20, %v253_v3  ;;  %v476_v40 = vmul.f32 %v2679_v46, %v3195_v27  ;;  %v254_v1 = vmul.f32 %v2724_v5, %v3189_v21  ;;  %v3220_v0 = vadd.f32 %v3211_v12, %v1069_v43 }
  0xa1   :  { %v3223_v45 = vadd.f32 %v3211_v12, %v1071_v56  ;;  %v3226_v2 = vadd.f32 %v3211_v12, %v1068_v33  ;;  %v3229_v7 = vadd.f32 %v3211_v12, %v1070_v19  ;;  %v527_v46 = vadd.f32 %v463_v63, %v239_v35 }
  0xa2   :  { %v3234_v54 = vadd.f32 %v3069_v26, %v541_v16  ;;  %v543_v23 = vadd.f32 %v479_v6, %v255_v22  ;;  %v524_v5 = vadd.f32 %v460_v57, %v236_v39  ;;  %v1021_v62 = vmul.f32 %v2733_v9, %v3231_v29  ;;  %v3261_v38 = vpop.permute.xlu1 %565  ;;  %v4691_v57 = vld [vmem:[#allocation67_spill] sm:$0xff] }
  0xa3   :  { %v1221_v43 = vmax.f32 %v3220_v0, 0.0  ;;  %v1023_v34 = vmul.f32 %v2736_v10, %v3231_v29  ;;  %v1223_v8 = vmax.f32 %v3223_v45, 0.0  ;;  %v1020_v60 = vmul.f32 %v2739_v11, %v3231_v29 }
  0xa4   :  { %v1220_v25 = vmax.f32 %v3226_v2, 0.0  ;;  %v1022_v35 = vmul.f32 %v2745_v13, %v3231_v29  ;;  %v1222_v39 = vmax.f32 %v3229_v7, 0.0  ;;  %v3248_v26 = vadd.f32 %v1021_v62, %v797_v30 }
  0xa5   :  { %v3250_v24 = vadd.f32 %v1023_v34, %v799_v42  ;;  %v831_v56 = vadd.f32 %v3073_v49, %v543_v23  ;;  %v540_v31 = vadd.f32 %v476_v40, %v252_v53  ;;  %v3253_v33 = vadd.f32 %v1020_v60, %v796_v59  ;;  %v4695_v34 = vld [vmem:[#allocation47_spill] sm:$0xff] }
  0xa6   :  { %v3255_v32 = vadd.f32 %v1022_v35, %v798_v17  ;;  %v462_v19 = vmul.f32 %v2682_v47, %v3175_v4  ;;  %v478_v3 = vmul.f32 %v2682_v47, %v3195_v27  ;;  %v225_v42 = vmul.f32 %v2748_v14, %v3157_v15  ;;  %v4696_v60 = vld [vmem:[#allocation55_spill] sm:$0xff] }
  0xa7   :  { %v828_v30 = vadd.f32 %v3077_v61, %v540_v31  ;;  %v497_v49 = vadd.f32 %v2949_v48, %v3161_v36  ;;  %v1025_v59 = vmul.f32 %v2773_v28, %v3231_v29  ;;  %v749_v17 = vmul.f32 %v2673_v44, %v3261_v38  ;;  %v3286_v62 = vpop.permute.xlu1 %853 }
  0xa8   :  { %v751_v20 = vmul.f32 %v2689_v50, %v3261_v38  ;;  %v748_v47 = vmul.f32 %v2693_v52, %v3261_v38  ;;  %v526_v61 = vadd.f32 %v462_v19, %v3151_v41  ;;  %v542_v22 = vadd.f32 %v478_v3, %v254_v1  ;;  %v4692_v52 = vld [vmem:[#allocation68_spill] sm:$0xff]  ;;  %v4693_v41 = vld [vmem:[#allocation46_spill] sm:$0xff] }
  0xa9   :  { %v750_v63 = vmul.f32 %v2700_v55, %v3261_v38  ;;  %v513_v36 = vadd.f32 %v3009_v37, %v225_v42  ;;  %v785_v48 = vadd.f32 %v3013_v51, %v497_v49  ;;  %v813_v6 = vadd.f32 %v749_v17, %v525_v58  ;;  %v4694_v55 = vld [vmem:[#allocation82_spill] sm:$0xff] }
  0xaa   :  { %v815_v53 = vadd.f32 %v751_v20, %v527_v46  ;;  %v812_v16 = vadd.f32 %v748_v47, %v524_v5  ;;  %v227_v44 = vmul.f32 %v2760_v18, %v3157_v15  ;;  %v830_v40 = vadd.f32 %v4691_v57, %v542_v22  ;;  %v4697_v58 = vld [vmem:[#allocation14_spill] sm:$0xff]  ;;  %v4698_v5 = vld [vmem:[#allocation12_spill] sm:$0xff] }
  0xab   :  { %v814_v50 = vadd.f32 %v750_v63, %v526_v61  ;;  %v801_v23 = vadd.f32 %v4692_v52, %v513_v36  ;;  %v1073_v1 = vadd.f32 %v4693_v41, %v785_v48  ;;  %v499_v37 = vadd.f32 %v4695_v34, %v4694_v55  ;;  %v4699_v20 = vld [vmem:[#allocation56_spill] sm:$0xff]  ;;  %v4700_v61 = vld [vmem:[#allocation69_spill] sm:$0xff]  ;;  %v3308_v57 = vpop.permute.xlu1 %857 }
  0xac   :  { %v515_v51 = vadd.f32 %v4696_v60, %v227_v44  ;;  %v1027_v46 = vmul.f32 %v4697_v58, %v3231_v29  ;;  %v224_v35 = vmul.f32 %v4698_v5, %v3157_v15  ;;  %v1037_v31 = vmul.f32 %v2733_v9, %v3286_v62  ;;  %v4701_v41 = vld [vmem:[#allocation48_spill] sm:$0xff]  ;;  %v4702_v60 = vld [vmem:[#allocation83_spill] sm:$0xff] }
  0xad   :  { %v1039_v19 = vmul.f32 %v2736_v10, %v3286_v62  ;;  %v1036_v3 = vmul.f32 %v2739_v11, %v3286_v62  ;;  %v1038_v42 = vmul.f32 %v2745_v13, %v3286_v62  ;;  %v1089_v49 = vadd.f32 %v1025_v59, %v801_v23  ;;  %v4703_v59 = vld [vmem:[#allocation50_spill] sm:$0xff] }
  0xae   :  { %v3304_v17 = vadd.f32 %v3211_v12, %v1073_v1  ;;  %v787_v47 = vadd.f32 %v4699_v20, %v499_v37  ;;  %v803_v22 = vadd.f32 %v4700_v61, %v515_v51  ;;  %v1101_v63 = vadd.f32 %v1037_v31, %v813_v6  ;;  %v4707_v61 = vld [vmem:[#allocation70_spill] sm:$0xff] }
  0xaf   :  { %v1103_v36 = vadd.f32 %v1039_v19, %v815_v53  ;;  %v1100_v48 = vadd.f32 %v1036_v3, %v812_v16  ;;  %v1102_v44 = vadd.f32 %v1038_v42, %v814_v50  ;;  %v496_v23 = vadd.f32 %v4703_v59, %v4702_v60  ;;  %v4704_v50 = vld [vmem:[#allocation57_spill] sm:$0xff]  ;;  %v4706_v19 = vld [vmem:[#allocation16_spill] sm:$0xff] }
  0xb0   :  { %v1225_v52 = vmax.f32 %v3304_v17, 0.0  ;;  %v1075_v55 = vadd.f32 %v4701_v41, %v787_v47  ;;  %v1091_v34 = vadd.f32 %v1027_v46, %v803_v22  ;;  %v1053_v1 = vmul.f32 %v2733_v9, %v3308_v57  ;;  %v4705_v46 = vld [vmem:[#allocation58_spill] sm:$0xff]  ;;  %v3328_v47 = vpop.permute.xlu0 %1153  ;;  %v3334_v60 = vpop.permute.xlu1 %1143  ;;  %v4715_v17 = vld [vmem:[#allocation77_spill] sm:$0xff] }
  0xb1   :  { %v1055_v37 = vmul.f32 %v2736_v10, %v3308_v57  ;;  %v1052_v6 = vmul.f32 %v2739_v11, %v3308_v57  ;;  %v1054_v53 = vmul.f32 %v2745_v13, %v3308_v57  ;;  %v512_v51 = vadd.f32 %v4704_v50, %v224_v35  ;;  %v4708_v13 = vld [vmem:[#allocation51_spill] sm:$0xff] }
  0xb2   :  { %v1163_v16 = vadd.f32 %v3211_v12, %v1075_v55  ;;  %v784_v31 = vadd.f32 %v4705_v46, %v496_v23  ;;  %v1024_v3 = vmul.f32 %v4706_v19, %v3231_v29  ;;  %v1117_v9 = vadd.f32 %v1053_v1, %v3234_v54  ;;  %v4709_v55 = vld [vmem:[#allocation15_spill] sm:$0xff] }
  0xb3   :  { %v1119_v42 = vadd.f32 %v1055_v37, %v831_v56  ;;  %v1116_v20 = vadd.f32 %v1052_v6, %v828_v30  ;;  %v1118_v10 = vadd.f32 %v1054_v53, %v830_v40  ;;  %v800_v22 = vadd.f32 %v4707_v61, %v512_v51 }
  0xb4   :  { %v1227_v11 = vmax.f32 %v1163_v16, 0.0  ;;  %v1072_v41 = vadd.f32 %v4708_v13, %v784_v31  ;;  %v226_v35 = vmul.f32 %v4709_v55, %v3157_v15  ;;  %v1205_v59 = vadd.f32 %v3328_v47, %v1117_v9 }
  0xb5   :  { %v1207_v23 = vadd.f32 %v3328_v47, %v1119_v42  ;;  %v1204_v54 = vadd.f32 %v3328_v47, %v1116_v20  ;;  %v1206_v56 = vadd.f32 %v3328_v47, %v1118_v10  ;;  %v1173_v30 = vadd.f32 %v3334_v60, %v3248_v26  ;;  %v3348_v42 = vpop.permute.xlu1 %1148 }
  0xb6   :  { %v1175_v40 = vadd.f32 %v3334_v60, %v3250_v24  ;;  %v1172_v1 = vadd.f32 %v3334_v60, %v3253_v33  ;;  %v1174_v37 = vadd.f32 %v3334_v60, %v3255_v32  ;;  %v1269_v6 = vmax.f32 %v1205_v59, 0.0 }
  0xb7   :  { %v1271_v53 = vmax.f32 %v1207_v23, 0.0  ;;  %v1268_v16 = vmax.f32 %v1204_v54, 0.0  ;;  %v1270_v50 = vmax.f32 %v1206_v56, 0.0  ;;  %v1237_v51 = vmax.f32 %v1173_v30, 0.0 }
  0xb8   :  { %v1239_v46 = vmax.f32 %v1175_v40, 0.0  ;;  %v1236_v31 = vmax.f32 %v1172_v1, 0.0  ;;  %v1238_v9 = vmax.f32 %v1174_v37, 0.0  ;;  %v1177_v26 = vadd.f32 %v3334_v60, %v1089_v49  ;;  %v4712_v1 = vld [vmem:[#allocation59_spill] sm:$0xff] }
  0xb9   :  { %v1179_v24 = vadd.f32 %v3334_v60, %v1091_v34  ;;  %v1088_v20 = vadd.f32 %v1024_v3, %v800_v22  ;;  %v1160_v33 = vadd.f32 %v3211_v12, %v1072_v41  ;;  %v2465_v32 = vpack.c.bf16 %v1237_v51, %v1221_v43  ;;  %v4710_v22 = vld [vmem:[#allocation84_spill] sm:$0xff] }
  0xba   :  { %v2473_v10 = vpack.c.bf16 %v1239_v46, %v1223_v8  ;;  %v2467_v61 = vpack.c.bf16 %v1236_v31, %v1220_v25  ;;  %v2475_v13 = vpack.c.bf16 %v1238_v9, %v1222_v39  ;;  %v1189_v59 = vadd.f32 %v3348_v42, %v1101_v63  ;;  %v4713_v51 = vld [vmem:[#allocation60_spill] sm:$0xff]  ;;  %v4714_v31 = vld [vmem:[#allocation18_spill] sm:$0xff] }
  0xbb   :  { %v1191_v49 = vadd.f32 %v3348_v42, %v1103_v36  ;;  %v1188_v34 = vadd.f32 %v3348_v42, %v1100_v48  ;;  %v1190_v3 = vadd.f32 %v3348_v42, %v1102_v44  ;;  %2466 = vmatprep.subr.bf16.mxu0 %v2465_v32  ;;  %v1241_v0 = vmax.f32 %v1177_v26, 0.0  ;;  %v4711_v44 = vld [vmem:[#allocation52_spill] sm:$0xff]  ;;  %v4718_v26 = vld [vmem:[#allocation53_spill] sm:$0xff] }
  0xbc   :  { %2474 = vmatprep.subr.bf16.mxu1 %v2473_v10  ;;  %v1243_v43 = vmax.f32 %v1179_v24, 0.0  ;;  %v1176_v45 = vadd.f32 %v3334_v60, %v1088_v20  ;;  %v1224_v8 = vmax.f32 %v1160_v33, 0.0  ;;  %2468 = vmatpush1.bf16.msra.mxu0 %v2467_v61  ;;  %v1253_v2 = vmax.f32 %v1189_v59, 0.0  ;;  %v4719_v33 = vld [vmem:[#allocation8_spill] sm:$0xff] }
  0xbd   :  { %2476 = vmatpush1.bf16.msra.mxu1 %v2475_v13  ;;  %v1255_v7 = vmax.f32 %v1191_v49, 0.0  ;;  %v1252_v25 = vmax.f32 %v1188_v34, 0.0  ;;  %v1254_v39 = vmax.f32 %v1190_v3, 0.0  ;;  %v2481_v63 = vpack.c.bf16 %v1241_v0, %v1225_v52 }
  0xbe   :  { %v2489_v36 = vpack.c.bf16 %v1243_v43, %v1227_v11  ;;  %v1240_v48 = vmax.f32 %v1176_v45, 0.0  ;;  %v498_v41 = vadd.f32 %v4711_v44, %v4710_v22  ;;  %v2469_v23 = vpack.c.bf16 %v1269_v6, %v1253_v2  ;;  %v4716_v6 = vld [vmem:[#allocation6_spill] sm:$0xff] }
  0xbf   :  { %v2477_v54 = vpack.c.bf16 %v1271_v53, %v1255_v7  ;;  %v2471_v56 = vpack.c.bf16 %v1268_v16, %v1252_v25  ;;  %v2479_v30 = vpack.c.bf16 %v1270_v50, %v1254_v39  ;;  %v514_v37 = vadd.f32 %v4712_v1, %v226_v35  ;;  %v3383_v35 = vld [vmem:[%s4529_s3] sm:$0xff]  ;;  %v4717_v16 = vld [vmem:[#allocation71_spill] sm:$0xff] }
  0xc0   :  { %v2483_v40 = vpack.c.bf16 %v1240_v48, %v1224_v8  ;;  %v786_v46 = vadd.f32 %v4713_v51, %v498_v41  ;;  %v1026_v9 = vmul.f32 %v4714_v31, %v3231_v29  ;;  %2470 = vmatprep.subr.bf16.mxu0 %v2469_v23  ;;  %v241_v52 = vmul.f32 %v2748_v14, %v4715_v17  ;;  %v4720_v8 = vld [vmem:[#allocation72_spill] sm:$0xff]  ;;  %v3412_v39 = vld [vmem:[%s4529_s3 + $0x8] sm:$0xff] }
  0xc1   :  { %2478 = vmatprep.subr.bf16.mxu1 %v2477_v54  ;;  %v257_v11 = vmul.f32 %v2748_v14, %v3189_v21  ;;  %v465_v53 = vmul.f32 %v4716_v6, %v3175_v4  ;;  %2472 = vmatpush1.bf16.msra.mxu0 %v2471_v56  ;;  %v802_v50 = vadd.f32 %v4717_v16, %v514_v37  ;;  %v4722_v25 = vmov 0.0  }
  0xc2   :  { %2480 = vmatpush1.bf16.msra.mxu1 %v2479_v30  ;;  %v1074_v24 = vadd.f32 %v4718_v26, %v786_v46  ;;  %v481_v20 = vmul.f32 %v4716_v6, %v3195_v27  ;;  %2482 = vmatprep.subr.bf16.mxu0 %v2481_v63  ;;  %v753_v32 = vmul.f32 %v4719_v33, %v3261_v38  ;;  %v4725_v6 = vld [vmem:[#allocation9_spill] sm:$0xff] }
  0xc3   :  { %2490 = vmatprep.subr.bf16.mxu1 %v2489_v36  ;;  %v529_v14 = vadd.f32 %v465_v53, %v241_v52  ;;  %v1041_v10 = vmul.f32 %v2773_v28, %v3286_v62  ;;  %v1090_v61 = vadd.f32 %v1026_v9, %v802_v50  ;;  %v1057_v49 = vmul.f32 %v2773_v28, %v3308_v57  ;;  %v4721_v28 = vld [vmem:[#allocation7_spill] sm:$0xff]  ;;  %v4724_v52 = vld [vmem:[#allocation73_spill] sm:$0xff] }
  0xc4   :  { %v1162_v13 = vadd.f32 %v3211_v12, %v1074_v24  ;;  %v545_v59 = vadd.f32 %v481_v20, %v257_v11  ;;  %2401 = vmatmul.mubr.msk.f32.vlgmr.msra.gmra.mrb[0].mxu0 %vm1340_vm0, %v3383_v35  ;;  %v243_v3 = vmul.f32 %v2760_v18, %v4715_v17  ;;  %v259_v0 = vmul.f32 %v2760_v18, %v3189_v21  ;;  %v4723_v36 = vld [vmem:[#allocation11_spill] sm:$0xff]  ;;  %v4726_v26 = vld [vmem:[#allocation13_spill] sm:$0xff] }
  0xc5   :  { %2409 = vmatmul.mubr.msk.f32.vlgmr.msra.gmra.mrb[0].mxu1 %vm1340_vm0, %v3383_v35  ;;  %v817_v34 = vadd.f32 %v753_v32, %v529_v14  ;;  %2484 = vmatpush1.bf16.msra.mxu0 %v2483_v40  ;;  %v1178_v43 = vadd.f32 %v3334_v60, %v1090_v61  ;;  %v467_v7 = vmul.f32 %v4721_v28, %v3175_v4 }
  0xc6   :  { %v1226_v45 = vmax.f32 %v1162_v13, 0.0  ;;  %v833_v2 = vadd.f32 %v4720_v8, %v545_v59  ;;  %1435 = vmatprep.mubr.f32.mxu0 %v4722_v25  ;;  %v483_v18 = vmul.f32 %v4721_v28, %v3195_v27  ;;  %v755_v48 = vmul.f32 %v4723_v36, %v3261_v38  ;;  %1548 = vmatprep.mubr.f32.mxu1 %v4722_v25  ;;  %v4729_v28 = vld [vmem:[#allocation17_spill] sm:$0xff] }
  0xc7   :  { %v1105_v63 = vadd.f32 %v1041_v10, %v817_v34  ;;  %v1043_v22 = vmul.f32 %v4697_v58, %v3286_v62  ;;  %v1242_v44 = vmax.f32 %v1178_v43, 0.0  ;;  %v531_v23 = vadd.f32 %v467_v7, %v243_v3  ;;  %v3463_v34 = vld [vmem:[%s4529_s3 + $0x18] sm:$0xff] }
  0xc8   :  { %v1121_v41 = vadd.f32 %v1057_v49, %v833_v2  ;;  %v1059_v54 = vmul.f32 %v4697_v58, %v3308_v57  ;;  %v547_v30 = vadd.f32 %v483_v18, %v259_v0  ;;  %2402 = vmatmul.mubr.msk.f32.gmra.mrb[2].mxu0 %vm1340_vm0, %v3412_v39  ;;  %v240_v40 = vmul.f32 %v4698_v5, %v4715_v17  ;;  %v3437_v58 = vld [vmem:[%s4529_s3 + $0x10] sm:$0xff]  ;;  %v4727_v0 = vld [vmem:[#allocation74_spill] sm:$0xff] }
  0xc9   :  { %v1193_v56 = vadd.f32 %v3348_v42, %v1105_v63  ;;  %2410 = vmatmul.mubr.msk.f32.gmra.mrb[2].mxu1 %vm1340_vm0, %v3412_v39  ;;  %v2491_v1 = vpack.c.bf16 %v1242_v44, %v1226_v45  ;;  %v819_v51 = vadd.f32 %v755_v48, %v531_v23  ;;  %v256_v46 = vmul.f32 %v4698_v5, %v3189_v21  ;;  %v4728_v45 = vld [vmem:[#allocation10_spill] sm:$0xff]  ;;  %v4730_v23 = vld [vmem:[#allocation76_spill] sm:$0xff] }
  0xca   :  { %v1209_v37 = vadd.f32 %v3328_v47, %v1121_v41  ;;  %1441 = vmatprep.mubr.f32.mxu0 %v4722_v25  ;;  %v835_v11 = vadd.f32 %v4724_v52, %v547_v30  ;;  %v464_v53 = vmul.f32 %v4725_v6, %v3175_v4  ;;  %v480_v16 = vmul.f32 %v4725_v6, %v3195_v27  ;;  %v4733_v52 = vld [vmem:[#allocation63_spill] sm:$0xff]  ;;  %v4734_v6 = vld [vmem:[#allocation64_spill] sm:$0xff] }
  0xcb   :  { %v1257_v9 = vmax.f32 %v1193_v56, 0.0  ;;  %1554 = vmatprep.mubr.f32.mxu1 %v4722_v25  ;;  %2492 = vmatpush1.bf16.msra.mxu1 %v2491_v1  ;;  %v1107_v50 = vadd.f32 %v1043_v22, %v819_v51  ;;  %v752_v24 = vmul.f32 %v4726_v26, %v3261_v38  ;;  %v1040_v20 = vmul.f32 %v4706_v19, %v3286_v62 }
  0xcc   :  { %v1273_v5 = vmax.f32 %v1209_v37, 0.0  ;;  %v1123_v14 = vadd.f32 %v1059_v54, %v835_v11  ;;  %v528_v33 = vadd.f32 %v464_v53, %v240_v40  ;;  %v544_v32 = vadd.f32 %v480_v16, %v256_v46  ;;  %2403 = vmatmul.mubr.msk.f32.gmra.mrb[4].mxu0 %vm1340_vm0, %v3437_v58  ;;  %v4731_v54 = vld [vmem:[#allocation20_spill] sm:$0xff]  ;;  %v3490_v40 = vld [vmem:[%s4529_s3 + $0x20] sm:$0xff]  ;;  %v4732_v46 = vld [vmem:[#allocation75_spill] sm:$0xff] }
  0xcd   :  { %v1056_v10 = vmul.f32 %v4706_v19, %v3308_v57  ;;  %v1195_v13 = vadd.f32 %v3348_v42, %v1107_v50  ;;  %v242_v59 = vmul.f32 %v4709_v55, %v4715_v17  ;;  %v258_v49 = vmul.f32 %v4709_v55, %v3189_v21  ;;  %2411 = vmatmul.mubr.msk.f32.gmra.mrb[4].mxu1 %vm1340_vm0, %v3437_v58  ;;  %v4735_v16 = vld [vmem:[#allocation26_spill] sm:$0xff] }
  0xce   :  { %v2485_v61 = vpack.c.bf16 %v1273_v5, %v1257_v9  ;;  %v1211_v19 = vadd.f32 %v3328_v47, %v1123_v14  ;;  %v816_v3 = vadd.f32 %v752_v24, %v528_v33  ;;  %v832_v43 = vadd.f32 %v4727_v0, %v544_v32  ;;  %1447 = vmatprep.mubr.f32.mxu0 %v4722_v25  ;;  %v4737_v32 = vld [vmem:[#allocation65_spill] sm:$0xff] }
  0xcf   :  { %v466_v8 = vmul.f32 %v4728_v45, %v3175_v4  ;;  %v1259_v55 = vmax.f32 %v1195_v13, 0.0  ;;  %v482_v2 = vmul.f32 %v4728_v45, %v3195_v27  ;;  %v754_v7 = vmul.f32 %v4729_v28, %v3261_v38  ;;  %1560 = vmatprep.mubr.f32.mxu1 %v4722_v25  ;;  %v4741_v45 = vld [vmem:[#allocation25_spill] sm:$0xff]  ;;  %v4742_v28 = vld [vmem:[#allocation66_spill] sm:$0xff] }
  0xd0   :  { %2486 = vmatprep.subr.bf16.mxu0 %v2485_v61  ;;  %v1042_v63 = vmul.f32 %v4714_v31, %v3286_v62  ;;  %v1275_v18 = vmax.f32 %v1211_v19, 0.0  ;;  %v1104_v36 = vadd.f32 %v1040_v20, %v816_v3  ;;  %v1120_v48 = vadd.f32 %v1056_v10, %v832_v43  ;;  %2404 = vmatmul.mubr.msk.f32.gmra.mrb[6].mxu0 %vm1340_vm0, %v3463_v34  ;;  %v4736_v20 = vld [vmem:[#allocation24_spill] sm:$0xff]  ;;  %v4738_v61 = vld [vmem:[#allocation78_spill] sm:$0xff]  ;;  %v4739_v3 = vld [vmem:[#allocation79_spill] sm:$0xff] }
  0xd1   :  { %v530_v22 = vadd.f32 %v466_v8, %v242_v59  ;;  %v546_v44 = vadd.f32 %v482_v2, %v258_v49  ;;  %v1058_v41 = vmul.f32 %v4714_v31, %v3308_v57  ;;  %v213_v56 = vmul.f32 %v4731_v54, %v4730_v23  ;;  %2412 = vmatmul.mubr.msk.f32.gmra.mrb[6].mxu1 %vm1340_vm0, %v3463_v34  ;;  %v4740_v43 = vld [vmem:[#allocation61_spill] sm:$0xff] }
  0xd2   :  { %v229_v30 = vmul.f32 %v4731_v54, %v3157_v15  ;;  %v2493_v1 = vpack.c.bf16 %v1275_v18, %v1259_v55  ;;  %v1192_v37 = vadd.f32 %v3348_v42, %v1104_v36  ;;  %v1208_v51 = vadd.f32 %v3328_v47, %v1120_v48  ;;  %1453 = vmatprep.mubr.f32.mxu0 %v4722_v25  ;;  %v3519_v55 = vld [vmem:[%s4529_s3 + $0x28] sm:$0xff]  ;;  %v4743_v18 = vld [vmem:[#allocation80_spill] sm:$0xff] }
  0xd3   :  { %v818_v31 = vadd.f32 %v754_v7, %v530_v22  ;;  %v834_v9 = vadd.f32 %v4732_v46, %v546_v44  ;;  %v501_v11 = vadd.f32 %v4733_v52, %v213_v56  ;;  %v1029_v5 = vmul.f32 %v4735_v16, %v3231_v29  ;;  %1566 = vmatprep.mubr.f32.mxu1 %v4722_v25  ;;  %v4744_v22 = vld [vmem:[#allocation81_spill] sm:$0xff]  ;;  %v4746_v56 = vld [vmem:[#allocation28_spill] sm:$0xff] }
  0xd4   :  { %v517_v53 = vadd.f32 %v4734_v6, %v229_v30  ;;  %2494 = vmatprep.subr.bf16.mxu1 %v2493_v1  ;;  %v1256_v50 = vmax.f32 %v1192_v37, 0.0  ;;  %v1272_v26 = vmax.f32 %v1208_v51, 0.0  ;;  %v215_v14 = vmul.f32 %v4736_v20, %v4730_v23  ;;  %2405 = vmatmul.mubr.msk.f32.gmra.mrb[8].mxu0 %vm1340_vm0, %v3490_v40  ;;  %v3541_v52 = vld [vmem:[%s4529_s3 + $0x30] sm:$0xff] }
  0xd5   :  { %v1106_v24 = vadd.f32 %v1042_v63, %v818_v31  ;;  %v1122_v33 = vadd.f32 %v1058_v41, %v834_v9  ;;  %v789_v10 = vadd.f32 %v4737_v32, %v501_v11  ;;  %v231_v59 = vmul.f32 %v4736_v20, %v3157_v15  ;;  %2413 = vmatmul.mubr.msk.f32.gmra.mrb[8].mxu1 %vm1340_vm0, %v3490_v40  ;;  %v4745_v41 = vld [vmem:[#allocation41_spill] sm:$0xff]  ;;  %v4747_v11 = vld [vmem:[#allocation27_spill] sm:$0xff] }
  0xd6   :  { %v805_v13 = vadd.f32 %v4738_v61, %v517_v53  ;;  %v2487_v49 = vpack.c.bf16 %v1272_v26, %v1256_v50  ;;  %v503_v0 = vadd.f32 %v4739_v3, %v215_v14  ;;  %v743_v8 = vmul.f32 %v4741_v45, %v4740_v43  ;;  %1459 = vmatprep.mubr.f32.mxu0 %v4722_v25  ;;  %v4749_v32 = vld [vmem:[#allocation23_spill] sm:$0xff]  ;;  %v4750_v61 = vld [vmem:[#allocation49_spill] sm:$0xff] }
  0xd7   :  { %v1194_v19 = vadd.f32 %v3348_v42, %v1106_v24  ;;  %v1210_v2 = vadd.f32 %v3328_v47, %v1122_v33  ;;  %v1077_v7 = vadd.f32 %v4742_v28, %v789_v10  ;;  %v519_v36 = vadd.f32 %v4743_v18, %v231_v59  ;;  %1572 = vmatprep.mubr.f32.mxu1 %v4722_v25  ;;  %v4748_v33 = vld [vmem:[#allocation40_spill] sm:$0xff]  ;;  %v4751_v59 = vld [vmem:[#allocation54_spill] sm:$0xff]  ;;  %v3565_v28 = vld [vmem:[%s4529_s3 + $0x38] sm:$0xff] }
  0xd8   :  { %v1093_v63 = vadd.f32 %v1029_v5, %v805_v13  ;;  %2488 = vmatpush1.bf16.msra.mxu0 %v2487_v49  ;;  %v791_v44 = vadd.f32 %v4744_v22, %v503_v0  ;;  %v1015_v30 = vmul.f32 %v4746_v56, %v4745_v41  ;;  %v1031_v1 = vmul.f32 %v4746_v56, %v3231_v29  ;;  %v4752_v49 = vld [vmem:[#allocation30_spill] sm:$0xff]  ;;  %v4753_v18 = vld [vmem:[#allocation32_spill] sm:$0xff] }
  0xd9   :  { %v1258_v48 = vmax.f32 %v1194_v19, 0.0  ;;  %v1274_v37 = vmax.f32 %v1210_v2, 0.0  ;;  %v1165_v51 = vadd.f32 %v3211_v12, %v1077_v7  ;;  %v807_v46 = vadd.f32 %v743_v8, %v519_v36  ;;  %2406 = vmatmul.mubr.msk.f32.gmra.mrb[10].mxu0 %vm1340_vm0, %v3519_v55  ;;  %2414 = vmatmul.mubr.msk.f32.gmra.mrb[10].mxu1 %vm1340_vm0, %v3519_v55 }
  0xda   :  { %v1181_v31 = vadd.f32 %v3334_v60, %v1093_v63  ;;  %v1079_v9 = vadd.f32 %v1015_v30, %v791_v44  ;;  %1465 = vmatprep.mubr.f32.mxu0 %v4722_v25  ;;  %1578 = vmatprep.mubr.f32.mxu1 %v4722_v25  ;;  %v212_v6 = vmul.f32 %v4747_v11, %v4730_v23  ;;  %v4754_v44 = vld [vmem:[#allocation33_spill] sm:$0xff] }
  0xdb   :  { %v228_v53 = vmul.f32 %v4747_v11, %v3157_v15  ;;  %v2495_v5 = vpack.c.bf16 %v1274_v37, %v1258_v48  ;;  %v1229_v50 = vmax.f32 %v1165_v51, 0.0  ;;  %v1095_v24 = vadd.f32 %v1031_v1, %v807_v46 }
  0xdc   :  { %v1245_v26 = vmax.f32 %v1181_v31, 0.0  ;;  %v1167_v14 = vadd.f32 %v3211_v12, %v1079_v9  ;;  %v436_v10 = vmul.f32 %v4749_v32, %v4748_v33  ;;  %v452_v13 = vmul.f32 %v4749_v32, %v4750_v61  ;;  %v4755_v31 = vld [vmem:[#allocation29_spill] sm:$0xff] }
  0xdd   :  { %v724_v19 = vmul.f32 %v4752_v49, %v4751_v59  ;;  %2496 = vmatpush1.bf16.msra.mxu1 %v2495_v5  ;;  %v1183_v0 = vadd.f32 %v3334_v60, %v1095_v24  ;;  %2407 = vmatmul.mubr.msk.f32.gmra.mrb[12].mxu0 %vm1340_vm0, %v3541_v52  ;;  %v740_v8 = vmul.f32 %v4752_v49, %v4740_v43 }
  0xde   :  { %v2497_v3 = vpack.c.bf16 %v1245_v26, %v1229_v50  ;;  %v1231_v2 = vmax.f32 %v1167_v14, 0.0  ;;  %2415 = vmatmul.mubr.msk.f32.gmra.mrb[12].mxu1 %vm1340_vm0, %v3541_v52  ;;  %1471 = vmatprep.mubr.f32.mxu0 %v4722_v25  ;;  %v500_v7 = vadd.f32 %v436_v10, %v212_v6  ;;  %v516_v63 = vadd.f32 %v452_v13, %v228_v53  ;;  %v4756_v53 = vld [vmem:[#allocation31_spill] sm:$0xff]  ;;  %v4757_v26 = vld [vmem:[#allocation34_spill] sm:$0xff] }
  0xdf   :  { %v1012_v36 = vmul.f32 %v4753_v18, %v4745_v41  ;;  %v1247_v48 = vmax.f32 %v1183_v0, 0.0  ;;  %1584 = vmatprep.mubr.f32.mxu1 %v4722_v25  ;;  %v1028_v22 = vmul.f32 %v4753_v18, %v3231_v29  ;;  %v214_v30 = vmul.f32 %v4754_v44, %v4730_v23 }
  0xe0   :  { %2498 = vmatprep.subr.bf16.mxu0 %v2497_v3  ;;  %v230_v1 = vmul.f32 %v4754_v44, %v3157_v15  ;;  %v788_v37 = vadd.f32 %v724_v19, %v500_v7  ;;  %v804_v51 = vadd.f32 %v740_v8, %v516_v63  ;;  %v438_v46 = vmul.f32 %v4755_v31, %v4748_v33 }
  0xe1   :  { %v454_v9 = vmul.f32 %v4755_v31, %v4750_v61  ;;  %v2505_v6 = vpack.c.bf16 %v1247_v48, %v1231_v2  ;;  %2408 = vmatmul.mubr.msk.f32.gmra.mrb[14].mxu0 %vm1340_vm0, %v3565_v28  ;;  %v726_v5 = vmul.f32 %v4756_v53, %v4751_v59  ;;  %v742_v50 = vmul.f32 %v4756_v53, %v4740_v43  ;;  %v4758_v48 = vld [vmem:[#allocation19_spill] sm:$0xff] }
  0xe2   :  { %v1014_v24 = vmul.f32 %v4757_v26, %v4745_v41  ;;  %2416 = vmatmul.mubr.msk.f32.gmra.mrb[14].mxu1 %vm1340_vm0, %v3565_v28  ;;  %1655 = vmatprep.mubr.f32.mxu0 %v4722_v25  ;;  %v1076_v14 = vadd.f32 %v1012_v36, %v788_v37  ;;  %v1092_v10 = vadd.f32 %v1028_v22, %v804_v51 }
  0xe3   :  { %v502_v13 = vadd.f32 %v438_v46, %v214_v30  ;;  %2506 = vmatprep.subr.bf16.mxu1 %v2505_v6  ;;  %1768 = vmatprep.mubr.f32.mxu1 %v4722_v25  ;;  %v518_v19 = vadd.f32 %v454_v9, %v230_v1  ;;  %v1030_v3 = vmul.f32 %v4757_v26, %v3231_v29  ;;  %v4759_v1 = vld [vmem:[#allocation21_spill] sm:$0xff] }
  0xe4   :  { %v245_v0 = vmul.f32 %v4731_v54, %v4715_v17  ;;  %v1164_v8 = vadd.f32 %v3211_v12, %v1076_v14  ;;  %v1180_v2 = vadd.f32 %v3334_v60, %v1092_v10  ;;  %v261_v63 = vmul.f32 %v4731_v54, %v3189_v21  ;;  %v4760_v54 = vld [vmem:[#allocation62_spill] sm:$0xff] }
  0xe5   :  { %v790_v7 = vadd.f32 %v726_v5, %v502_v13  ;;  %2417 = vmatmul.mubr.msk.f32.vlgmr.msra.gmra.mrb[16].mxu0 %vm1340_vm0, %v3383_v35  ;;  %v806_v36 = vadd.f32 %v742_v50, %v518_v19  ;;  %v469_v22 = vmul.f32 %v4758_v48, %v3175_v4  ;;  %v485_v30 = vmul.f32 %v4758_v48, %v3195_v27 }
  0xe6   :  { %v757_v37 = vmul.f32 %v4759_v1, %v3261_v38  ;;  %2425 = vmatmul.mubr.msk.f32.vlgmr.msra.gmra.mrb[16].mxu1 %vm1340_vm0, %v3383_v35  ;;  %v1228_v51 = vmax.f32 %v1164_v8, 0.0  ;;  %v1244_v46 = vmax.f32 %v1180_v2, 0.0  ;;  %v773_v6 = vmul.f32 %v4759_v1, %v4760_v54  ;;  %1661 = vmatprep.mubr.f32.mxu0 %v4722_v25 }
  0xe7   :  { %v1078_v9 = vadd.f32 %v1014_v24, %v790_v7  ;;  %v1094_v5 = vadd.f32 %v1030_v3, %v806_v36  ;;  %v533_v50 = vadd.f32 %v469_v22, %v245_v0  ;;  %v549_v14 = vadd.f32 %v485_v30, %v261_v63  ;;  %1774 = vmatprep.mubr.f32.mxu1 %v4722_v25  ;;  %v4761_v36 = vld [vmem:[#allocation22_spill] sm:$0xff] }
  0xe8   :  { %v1045_v10 = vmul.f32 %v4735_v16, %v3286_v62  ;;  %v2499_v13 = vpack.c.bf16 %v1244_v46, %v1228_v51  ;;  %v1061_v8 = vmul.f32 %v4735_v16, %v3308_v57  ;;  %v247_v24 = vmul.f32 %v4736_v20, %v4715_v17 }
  0xe9   :  { %v1166_v19 = vadd.f32 %v3211_v12, %v1078_v9  ;;  %v1182_v2 = vadd.f32 %v3334_v60, %v1094_v5  ;;  %v821_v7 = vadd.f32 %v757_v37, %v533_v50  ;;  %v837_v3 = vadd.f32 %v773_v6, %v549_v14  ;;  %2418 = vmatmul.mubr.msk.f32.gmra.mrb[18].mxu0 %vm1340_vm0, %v3412_v39 }
  0xea   :  { %v263_v0 = vmul.f32 %v4736_v20, %v3189_v21  ;;  %2500 = vmatpush1.bf16.msra.mxu0 %v2499_v13  ;;  %v471_v48 = vmul.f32 %v4761_v36, %v3175_v4  ;;  %v487_v16 = vmul.f32 %v4761_v36, %v3195_v27  ;;  %v759_v22 = vmul.f32 %v4741_v45, %v3261_v38 }
  0xeb   :  { %v1230_v63 = vmax.f32 %v1166_v19, 0.0  ;;  %2426 = vmatmul.mubr.msk.f32.gmra.mrb[18].mxu1 %vm1340_vm0, %v3412_v39  ;;  %v1246_v30 = vmax.f32 %v1182_v2, 0.0  ;;  %v1109_v1 = vadd.f32 %v1045_v10, %v821_v7  ;;  %v1125_v20 = vadd.f32 %v1061_v8, %v837_v3  ;;  %1667 = vmatprep.mubr.f32.mxu0 %v4722_v25 }
  0xec   :  { %v775_v37 = vmul.f32 %v4741_v45, %v4760_v54  ;;  %1780 = vmatprep.mubr.f32.mxu1 %v4722_v25  ;;  %v535_v51 = vadd.f32 %v471_v48, %v247_v24  ;;  %v551_v46 = vadd.f32 %v487_v16, %v263_v0  ;;  %v1047_v9 = vmul.f32 %v4746_v56, %v3286_v62 }
  0xed   :  { %v1063_v6 = vmul.f32 %v4746_v56, %v3308_v57  ;;  %v2507_v5 = vpack.c.bf16 %v1246_v30, %v1230_v63  ;;  %v1197_v50 = vadd.f32 %v3348_v42, %v1109_v1  ;;  %v1213_v14 = vadd.f32 %v3328_v47, %v1125_v20  ;;  %2419 = vmatmul.mubr.msk.f32.gmra.mrb[20].mxu0 %vm1340_vm0, %v3437_v58 }
  0xee   :  { %v244_v45 = vmul.f32 %v4747_v11, %v4715_v17  ;;  %v823_v10 = vadd.f32 %v759_v22, %v535_v51  ;;  %v839_v13 = vadd.f32 %v775_v37, %v551_v46  ;;  %v260_v19 = vmul.f32 %v4747_v11, %v3189_v21  ;;  %1673 = vmatprep.mubr.f32.mxu0 %v4722_v25 }
  0xef   :  { %v468_v8 = vmul.f32 %v4749_v32, %v3175_v4  ;;  %2427 = vmatmul.mubr.msk.f32.gmra.mrb[20].mxu1 %vm1340_vm0, %v3437_v58  ;;  %v1261_v56 = vmax.f32 %v1197_v50, 0.0  ;;  %v1277_v24 = vmax.f32 %v1213_v14, 0.0  ;;  %v484_v2 = vmul.f32 %v4749_v32, %v3195_v27 }
  0xf0   :  { %2508 = vmatpush1.bf16.msra.mxu1 %v2507_v5  ;;  %v756_v7 = vmul.f32 %v4752_v49, %v3261_v38  ;;  %v1111_v3 = vadd.f32 %v1047_v9, %v823_v10  ;;  %v1127_v0 = vadd.f32 %v1063_v6, %v839_v13  ;;  %v772_v63 = vmul.f32 %v4752_v49, %v4760_v54 }
  0xf1   :  { %v532_v11 = vadd.f32 %v468_v8, %v244_v45  ;;  %1786 = vmatprep.mubr.f32.mxu1 %v4722_v25  ;;  %v2501_v36 = vpack.c.bf16 %v1277_v24, %v1261_v56  ;;  %v548_v48 = vadd.f32 %v484_v2, %v260_v19  ;;  %v1044_v16 = vmul.f32 %v4753_v18, %v3286_v62 }
  0xf2   :  { %v1060_v32 = vmul.f32 %v4753_v18, %v3308_v57  ;;  %2420 = vmatmul.mubr.msk.f32.gmra.mrb[22].mxu0 %vm1340_vm0, %v3463_v34  ;;  %v1199_v22 = vadd.f32 %v3348_v42, %v1111_v3  ;;  %v1215_v30 = vadd.f32 %v3328_v47, %v1127_v0  ;;  %v246_v49 = vmul.f32 %v4754_v44, %v4715_v17  ;;  %v4763_v0 = vld [vmem:[#allocation35_spill] sm:$0xff] }
  0xf3   :  { %v820_v1 = vadd.f32 %v756_v7, %v532_v11  ;;  %2428 = vmatmul.mubr.msk.f32.gmra.mrb[22].mxu1 %vm1340_vm0, %v3463_v34  ;;  %2502 = vmatprep.subr.bf16.mxu0 %v2501_v36  ;;  %v836_v20 = vadd.f32 %v772_v63, %v548_v48  ;;  %v262_v37 = vmul.f32 %v4754_v44, %v3189_v21 }
  0xf4   :  { %v470_v18 = vmul.f32 %v4755_v31, %v3175_v4  ;;  %v486_v51 = vmul.f32 %v4755_v31, %v3195_v27  ;;  %v1263_v46 = vmax.f32 %v1199_v22, 0.0  ;;  %v1279_v9 = vmax.f32 %v1215_v30, 0.0  ;;  %1679 = vmatprep.mubr.f32.mxu0 %v4722_v25  ;;  %1792 = vmatprep.mubr.f32.mxu1 %v4722_v25 }
  0xf5   :  { %v1108_v6 = vadd.f32 %v1044_v16, %v820_v1  ;;  %v758_v5 = vmul.f32 %v4756_v53, %v3261_v38  ;;  %v1124_v50 = vadd.f32 %v1060_v32, %v836_v20  ;;  %v774_v44 = vmul.f32 %v4756_v53, %v4760_v54  ;;  %v4762_v53 = vld [vmem:[#allocation36_spill] sm:$0xff]  ;;  %v4764_v16 = vld [vmem:[#allocation37_spill] sm:$0xff] }
  0xf6   :  { %v534_v14 = vadd.f32 %v470_v18, %v246_v49  ;;  %v550_v45 = vadd.f32 %v486_v51, %v262_v37  ;;  %2421 = vmatmul.mubr.msk.f32.gmra.mrb[24].mxu0 %vm1340_vm0, %v3490_v40  ;;  %v2509_v31 = vpack.c.bf16 %v1279_v9, %v1263_v46  ;;  %v1046_v13 = vmul.f32 %v4757_v26, %v3286_v62  ;;  %v4765_v49 = vld [vmem:[#allocation42_spill] sm:$0xff] }
  0xf7   :  { %v1196_v10 = vadd.f32 %v3348_v42, %v1108_v6  ;;  %v1062_v19 = vmul.f32 %v4757_v26, %v3308_v57  ;;  %2429 = vmatmul.mubr.msk.f32.gmra.mrb[24].mxu1 %vm1340_vm0, %v3490_v40  ;;  %v1212_v8 = vadd.f32 %v3328_v47, %v1124_v50  ;;  %v217_v2 = vmul.f32 %v4762_v53, %v4730_v23 }
  0xf8   :  { %v822_v56 = vadd.f32 %v758_v5, %v534_v14  ;;  %v838_v24 = vadd.f32 %v774_v44, %v550_v45  ;;  %1685 = vmatprep.mubr.f32.mxu0 %v4722_v25  ;;  %2510 = vmatprep.subr.bf16.mxu1 %v2509_v31  ;;  %v233_v3 = vmul.f32 %v4762_v53, %v3157_v15  ;;  %v4766_v5 = vld [vmem:[#allocation43_spill] sm:$0xff]  ;;  %v4767_v31 = vld [vmem:[#allocation38_spill] sm:$0xff] }
  0xf9   :  { %v1260_v7 = vmax.f32 %v1196_v10, 0.0  ;;  %v441_v26 = vmul.f32 %v4763_v0, %v4748_v33  ;;  %v457_v11 = vmul.f32 %v4763_v0, %v4750_v61  ;;  %1798 = vmatprep.mubr.f32.mxu1 %v4722_v25  ;;  %v1276_v63 = vmax.f32 %v1212_v8, 0.0 }
  0xfa   :  { %v1110_v36 = vadd.f32 %v1046_v13, %v822_v56  ;;  %v1126_v48 = vadd.f32 %v1062_v19, %v838_v24  ;;  %v729_v32 = vmul.f32 %v4764_v16, %v4751_v59  ;;  %2422 = vmatmul.mubr.msk.f32.gmra.mrb[26].mxu0 %vm1340_vm0, %v3519_v55  ;;  %v745_v1 = vmul.f32 %v4764_v16, %v4740_v43  ;;  %v4768_v56 = vld [vmem:[#allocation44_spill] sm:$0xff] }
  0xfb   :  { %v505_v22 = vadd.f32 %v441_v26, %v217_v2  ;;  %v521_v30 = vadd.f32 %v457_v11, %v233_v3  ;;  %v1017_v20 = vmul.f32 %v4765_v49, %v4745_v41  ;;  %2430 = vmatmul.mubr.msk.f32.gmra.mrb[26].mxu1 %vm1340_vm0, %v3519_v55  ;;  %v2503_v37 = vpack.c.bf16 %v1276_v63, %v1260_v7  ;;  %v3739_v11 = vld [vmem:[%s4528_s0 + $0x38] sm:$0xff] }
  0xfc   :  { %v1198_v18 = vadd.f32 %v3348_v42, %v1110_v36  ;;  %v1214_v51 = vadd.f32 %v3328_v47, %v1126_v48  ;;  %v1033_v46 = vmul.f32 %v4765_v49, %v3231_v29  ;;  %1691 = vmatprep.mubr.f32.mxu0 %v4722_v25  ;;  %v219_v50 = vmul.f32 %v4766_v5, %v4730_v23  ;;  %v4769_v63 = vld [vmem:[#allocation5_spill] sm:$0xff] }
  0xfd   :  { %v793_v9 = vadd.f32 %v729_v32, %v505_v22  ;;  %v809_v6 = vadd.f32 %v745_v1, %v521_v30  ;;  %v235_v14 = vmul.f32 %v4766_v5, %v3157_v15  ;;  %1804 = vmatprep.mubr.f32.mxu1 %v4722_v25  ;;  %2504 = vmatpush1.bf16.msra.mxu0 %v2503_v37  ;;  %v2546_v22 = vld [vmem:[%s4528_s0 + $0x30] sm:$0xff]  ;;  %v4770_v30 = vld [vmem:[#allocation3_spill] sm:$0xff] }
  0xfe   :  { %v1262_v45 = vmax.f32 %v1198_v18, 0.0  ;;  %v1278_v44 = vmax.f32 %v1214_v51, 0.0  ;;  %v443_v10 = vmul.f32 %v4767_v31, %v4748_v33  ;;  %v459_v13 = vmul.f32 %v4767_v31, %v4750_v61  ;;  %2423 = vmatmul.mubr.msk.f32.gmra.mrb[28].mxu0 %vm1340_vm0, %v3541_v52  ;;  %v4771_v18 = vld [vmem:[#allocation4_spill] sm:$0xff] }
  0xff   :  { %v1081_v19 = vadd.f32 %v1017_v20, %v793_v9  ;;  %v1097_v8 = vadd.f32 %v1033_v46, %v809_v6  ;;  %v731_v24 = vmul.f32 %v4768_v56, %v4751_v59  ;;  %v747_v2 = vmul.f32 %v4768_v56, %v4740_v43  ;;  %2431 = vmatmul.mubr.msk.f32.gmra.mrb[28].mxu1 %vm1340_vm0, %v3541_v52  ;;  %v4772_v46 = vld [vmem:[#allocation39_spill] sm:$0xff] }
 0x100   :  { %v2511_v7 = vpack.c.bf16 %v1278_v44, %v1262_v45  ;;  %v507_v3 = vadd.f32 %v443_v10, %v219_v50  ;;  %v523_v26 = vadd.f32 %v459_v13, %v235_v14  ;;  %v923_v36 = vrot.slane %v3739_v11, %v4769_v63  ;;  %1697 = vmatprep.mubr.f32.mxu0 %v4722_v25  ;;  %v4773_v13 = vld [vmem:[#allocation2_spill] sm:$0xff] }
 0x101   :  { %v1169_v48 = vadd.f32 %v3211_v12, %v1081_v19  ;;  %v1185_v32 = vadd.f32 %v3334_v60, %v1097_v8  ;;  %1810 = vmatprep.mubr.f32.mxu1 %v4722_v25  ;;  %v111_v1 = vrot.slane %v2546_v22, %v4770_v30  ;;  %v440_v9 = vmul.f32 %v4772_v46, %v4748_v33 }
 0x102   :  { %2512 = vmatpush1.bf16.msra.mxu1 %v2511_v7  ;;  %v795_v20 = vadd.f32 %v731_v24, %v507_v3  ;;  %v811_v37 = vadd.f32 %v747_v2, %v523_v26  ;;  %v3754_v51 = vrot.slane %v923_v36, %v4771_v18  ;;  %2424 = vmatmul.mubr.msk.f32.gmra.mrb[30].mxu0 %vm1340_vm0, %v3565_v28 }
 0x103   :  { %v1233_v6 = vmax.f32 %v1169_v48, 0.0  ;;  %v1249_v50 = vmax.f32 %v1185_v32, 0.0  ;;  %v3761_v14 = vrot.slane %v111_v1, %v4770_v30  ;;  %v456_v45 = vmul.f32 %v4772_v46, %v4750_v61  ;;  %2432 = vmatmul.mubr.msk.f32.gmra.mrb[30].mxu1 %vm1340_vm0, %v3565_v28  ;;  %1881 = vmatprep.mubr.f32.mxu0 %v4722_v25 }
 0x104   :  { %v1019_v44 = vmul.f32 %v3754_v51, %v4745_v41  ;;  %v1035_v10 = vmul.f32 %v3754_v51, %v3231_v29  ;;  %v623_v19 = vrot.slane %v2546_v22, %v4773_v13  ;;  %1994 = vmatprep.mubr.f32.mxu1 %v4722_v25  ;;  %v911_v7 = vrot.slane %v2546_v22, %v4771_v18 }
 0x105   :  { %v2513_v8 = vpack.c.bf16 %v1249_v50, %v1233_v6  ;;  %v216_v24 = vmul.f32 %v3761_v14, %v4730_v23  ;;  %v232_v2 = vmul.f32 %v3761_v14, %v3157_v15  ;;  %v119_v36 = vrot.slane %v3739_v11, %v4770_v30 }
 0x106   :  { %v1083_v3 = vadd.f32 %v1019_v44, %v795_v20  ;;  %v1099_v26 = vadd.f32 %v1035_v10, %v811_v37  ;;  %v3780_v63 = vrot.slane %v623_v19, %v4773_v13  ;;  %2433 = vmatmul.mubr.msk.f32.vlgmr.msra.gmra.mrb[32].mxu0 %vm1340_vm0, %v3383_v35  ;;  %v3787_v1 = vrot.slane %v911_v7, %v4771_v18  ;;  %v4774_v44 = vld [vmem:[#allocation45_spill] sm:$0xff] }
 0x107   :  { %2514 = vmatprep.subr.bf16.mxu0 %v2513_v8  ;;  %v504_v48 = vadd.f32 %v440_v9, %v216_v24  ;;  %v520_v32 = vadd.f32 %v456_v45, %v232_v2  ;;  %2441 = vmatmul.mubr.msk.f32.vlgmr.msra.gmra.mrb[32].mxu1 %vm1340_vm0, %v3383_v35  ;;  %v3802_v45 = vrot.slane %v119_v36, %v4770_v30 }
 0x108   :  { %v1171_v6 = vadd.f32 %v3211_v12, %v1083_v3  ;;  %v1187_v22 = vadd.f32 %v3334_v60, %v1099_v26  ;;  %v728_v20 = vmul.f32 %v3780_v63, %v4751_v59  ;;  %v744_v37 = vmul.f32 %v3780_v63, %v4740_v43  ;;  %1887 = vmatprep.mubr.f32.mxu0 %v4722_v25 }
 0x109   :  { %v1016_v9 = vmul.f32 %v3787_v1, %v4745_v41  ;;  %v1032_v50 = vmul.f32 %v3787_v1, %v3231_v29  ;;  %v442_v10 = vmul.f32 %v4774_v44, %v4748_v33  ;;  %2000 = vmatprep.mubr.f32.mxu1 %v4722_v25  ;;  %v218_v2 = vmul.f32 %v3802_v45, %v4730_v23 }
 0x10a   :  { %v1235_v35 = vmax.f32 %v1171_v6, 0.0  ;;  %v1251_v19 = vmax.f32 %v1187_v22, 0.0  ;;  %v792_v8 = vadd.f32 %v728_v20, %v504_v48  ;;  %v808_v24 = vadd.f32 %v744_v37, %v520_v32  ;;  %2434 = vmatmul.mubr.msk.f32.gmra.mrb[34].mxu0 %vm1340_vm0, %v3412_v39 }
 0x10b   :  { %v234_v7 = vmul.f32 %v3802_v45, %v3157_v15  ;;  %v458_v30 = vmul.f32 %v4774_v44, %v4750_v61  ;;  %v631_v33 = vrot.slane %v3739_v11, %v4773_v13  ;;  %v919_v48 = vrot.slane %v3739_v11, %v4771_v18  ;;  %2442 = vmatmul.mubr.msk.f32.gmra.mrb[34].mxu1 %vm1340_vm0, %v3412_v39 }
 0x10c   :  { %v2521_v3 = vpack.c.bf16 %v1251_v19, %v1235_v35  ;;  %v1080_v26 = vadd.f32 %v1016_v9, %v792_v8  ;;  %v1096_v36 = vadd.f32 %v1032_v50, %v808_v24  ;;  %v506_v23 = vadd.f32 %v442_v10, %v218_v2  ;;  %1893 = vmatprep.mubr.f32.mxu0 %v4722_v25 }
 0x10d   :  { %v522_v15 = vadd.f32 %v458_v30, %v234_v7  ;;  %v3823_v32 = vrot.slane %v631_v33, %v4773_v13  ;;  %v249_v61 = vmul.f32 %v4762_v53, %v4715_v17  ;;  %v3831_v11 = vrot.slane %v919_v48, %v4771_v18  ;;  %2006 = vmatprep.mubr.f32.mxu1 %v4722_v25 }
 0x10e   :  { %2522 = vmatprep.subr.bf16.mxu1 %v2521_v3  ;;  %v1168_v6 = vadd.f32 %v3211_v12, %v1080_v26  ;;  %v1184_v22 = vadd.f32 %v3334_v60, %v1096_v36  ;;  %v265_v20 = vmul.f32 %v4762_v53, %v3189_v21  ;;  %v473_v9 = vmul.f32 %v4763_v0, %v3175_v4 }
 0x10f   :  { %v730_v13 = vmul.f32 %v3823_v32, %v4751_v59  ;;  %v746_v37 = vmul.f32 %v3823_v32, %v4740_v43  ;;  %v489_v50 = vmul.f32 %v4763_v0, %v3195_v27  ;;  %v1018_v35 = vmul.f32 %v3831_v11, %v4745_v41  ;;  %2435 = vmatmul.mubr.msk.f32.gmra.mrb[36].mxu0 %vm1340_vm0, %v3437_v58 }
 0x110   :  { %v1232_v10 = vmax.f32 %v1168_v6, 0.0  ;;  %v1248_v18 = vmax.f32 %v1184_v22, 0.0  ;;  %v1034_v53 = vmul.f32 %v3831_v11, %v3231_v29  ;;  %2443 = vmatmul.mubr.msk.f32.gmra.mrb[36].mxu1 %vm1340_vm0, %v3437_v58  ;;  %v537_v19 = vadd.f32 %v473_v9, %v249_v61  ;;  %1899 = vmatprep.mubr.f32.mxu0 %v4722_v25 }
 0x111   :  { %v794_v43 = vadd.f32 %v730_v13, %v506_v23  ;;  %v810_v59 = vadd.f32 %v746_v37, %v522_v15  ;;  %v553_v0 = vadd.f32 %v489_v50, %v265_v20  ;;  %v761_v24 = vmul.f32 %v4764_v16, %v3261_v38  ;;  %2012 = vmatprep.mubr.f32.mxu1 %v4722_v25 }
 0x112   :  { %v2515_v8 = vpack.c.bf16 %v1248_v18, %v1232_v10  ;;  %v777_v41 = vmul.f32 %v4764_v16, %v4760_v54  ;;  %v1049_v29 = vmul.f32 %v4765_v49, %v3286_v62  ;;  %v1065_v30 = vmul.f32 %v4765_v49, %v3308_v57 }
 0x113   :  { %v1082_v2 = vadd.f32 %v1018_v35, %v794_v43  ;;  %v1098_v7 = vadd.f32 %v1034_v53, %v810_v59  ;;  %v251_v33 = vmul.f32 %v4766_v5, %v4715_v17  ;;  %v825_v3 = vadd.f32 %v761_v24, %v537_v19  ;;  %2436 = vmatmul.mubr.msk.f32.gmra.mrb[38].mxu0 %vm1340_vm0, %v3463_v34 }
 0x114   :  { %2516 = vmatpush1.bf16.msra.mxu0 %v2515_v8  ;;  %v841_v26 = vadd.f32 %v777_v41, %v553_v0  ;;  %v267_v36 = vmul.f32 %v4766_v5, %v3189_v21  ;;  %v475_v16 = vmul.f32 %v4767_v31, %v3175_v4  ;;  %v491_v15 = vmul.f32 %v4767_v31, %v3195_v27 }
 0x115   :  { %v1170_v48 = vadd.f32 %v3211_v12, %v1082_v2  ;;  %v1186_v23 = vadd.f32 %v3334_v60, %v1098_v7  ;;  %v763_v49 = vmul.f32 %v4768_v56, %v3261_v38  ;;  %v1113_v61 = vadd.f32 %v1049_v29, %v825_v3  ;;  %2444 = vmatmul.mubr.msk.f32.gmra.mrb[38].mxu1 %vm1340_vm0, %v3463_v34 }
 0x116   :  { %v1129_v6 = vadd.f32 %v1065_v30, %v841_v26  ;;  %v539_v22 = vadd.f32 %v475_v16, %v251_v33  ;;  %v779_v5 = vmul.f32 %v4768_v56, %v4760_v54  ;;  %v555_v20 = vadd.f32 %v491_v15, %v267_v36  ;;  %1905 = vmatprep.mubr.f32.mxu0 %v4722_v25 }
 0x117   :  { %v1234_v12 = vmax.f32 %v1170_v48, 0.0  ;;  %v1250_v60 = vmax.f32 %v1186_v23, 0.0  ;;  %v1051_v31 = vmul.f32 %v3754_v51, %v3286_v62  ;;  %2018 = vmatprep.mubr.f32.mxu1 %v4722_v25  ;;  %v1201_v13 = vadd.f32 %v3348_v42, %v1113_v61  ;;  %2437 = vmatmul.mubr.msk.f32.gmra.mrb[40].mxu0 %vm1340_vm0, %v3490_v40 }
 0x118   :  { %v1217_v37 = vadd.f32 %v3328_v47, %v1129_v6  ;;  %v827_v9 = vadd.f32 %v763_v49, %v539_v22  ;;  %v1067_v56 = vmul.f32 %v3754_v51, %v3308_v57  ;;  %v843_v10 = vadd.f32 %v779_v5, %v555_v20  ;;  %1911 = vmatprep.mubr.f32.mxu0 %v4722_v25 }
 0x119   :  { %v2523_v50 = vpack.c.bf16 %v1250_v60, %v1234_v12  ;;  %v248_v18 = vmul.f32 %v3761_v14, %v4715_v17  ;;  %v264_v35 = vmul.f32 %v3761_v14, %v3189_v21  ;;  %v1265_v53 = vmax.f32 %v1201_v13, 0.0  ;;  %2445 = vmatmul.mubr.msk.f32.gmra.mrb[40].mxu1 %vm1340_vm0, %v3490_v40  ;;  %v2547_v13 = vld [vmem:[%s4529_s3] sm:$0xff] }
 0x11a   :  { %v1281_v43 = vmax.f32 %v1217_v37, 0.0  ;;  %v1115_v59 = vadd.f32 %v1051_v31, %v827_v9  ;;  %v472_v19 = vmul.f32 %v4772_v46, %v3175_v4  ;;  %v1131_v51 = vadd.f32 %v1067_v56, %v843_v10  ;;  %2024 = vmatprep.mubr.f32.mxu1 %v4722_v25  ;;  %v4003_v9 = vpop.permute.xlu0 %1307 }
 0x11b   :  { %2524 = vmatpush1.bf16.msra.mxu1 %v2523_v50  ;;  %v488_v0 = vmul.f32 %v4772_v46, %v3195_v27  ;;  %v760_v14 = vmul.f32 %v3780_v63, %v3261_v38  ;;  %v776_v8 = vmul.f32 %v3780_v63, %v4760_v54  ;;  %v1048_v2 = vmul.f32 %v3787_v1, %v3286_v62 }
 0x11c   :  { %v2517_v24 = vpack.c.bf16 %v1281_v43, %v1265_v53  ;;  %v1203_v41 = vadd.f32 %v3348_v42, %v1115_v59  ;;  %v536_v29 = vadd.f32 %v472_v19, %v248_v18  ;;  %v1219_v7 = vadd.f32 %v3328_v47, %v1131_v51  ;;  %2438 = vmatmul.mubr.msk.f32.gmra.mrb[42].mxu0 %vm1340_vm0, %v3519_v55 }
 0x11d   :  { %v552_v30 = vadd.f32 %v488_v0, %v264_v35  ;;  %v1064_v46 = vmul.f32 %v3787_v1, %v3308_v57  ;;  %v250_v33 = vmul.f32 %v3802_v45, %v4715_v17  ;;  %v266_v26 = vmul.f32 %v3802_v45, %v3189_v21  ;;  %2446 = vmatmul.mubr.msk.f32.gmra.mrb[42].mxu1 %vm1340_vm0, %v3519_v55 }
 0x11e   :  { %2518 = vmatprep.subr.bf16.mxu0 %v2517_v24  ;;  %v1267_v63 = vmax.f32 %v1203_v41, 0.0  ;;  %v824_v3 = vadd.f32 %v760_v14, %v536_v29  ;;  %v474_v36 = vmul.f32 %v4774_v44, %v3175_v4  ;;  %v1283_v16 = vmax.f32 %v1219_v7, 0.0  ;;  %1917 = vmatprep.mubr.f32.mxu0 %v4722_v25  ;;  %v4042_v29 = vpop.permute.xlu0 %1317 }
 0x11f   :  { %v840_v1 = vadd.f32 %v776_v8, %v552_v30  ;;  %v490_v17 = vmul.f32 %v4774_v44, %v3195_v27  ;;  %v762_v48 = vmul.f32 %v3823_v32, %v3261_v38  ;;  %2030 = vmatprep.mubr.f32.mxu1 %v4722_v25  ;;  %v778_v4 = vmul.f32 %v3823_v32, %v4760_v54 }
 0x120   :  { %v1112_v23 = vadd.f32 %v1048_v2, %v824_v3  ;;  %v538_v21 = vadd.f32 %v474_v36, %v250_v33  ;;  %v1050_v45 = vmul.f32 %v3831_v11, %v3286_v62  ;;  %v2525_v15 = vpack.c.bf16 %v1283_v16, %v1267_v63  ;;  %2439 = vmatmul.mubr.msk.f32.gmra.mrb[44].mxu0 %vm1340_vm0, %v3541_v52 }
 0x121   :  { %v1128_v49 = vadd.f32 %v1064_v46, %v840_v1  ;;  %v554_v61 = vadd.f32 %v490_v17, %v266_v26  ;;  %v1066_v27 = vmul.f32 %v3831_v11, %v3308_v57  ;;  %2447 = vmatmul.mubr.msk.f32.gmra.mrb[44].mxu1 %vm1340_vm0, %v3541_v52  ;;  %1923 = vmatprep.mubr.f32.mxu0 %v4722_v25 }
 0x122   :  { %v1200_v38 = vadd.f32 %v3348_v42, %v1112_v23  ;;  %v826_v44 = vadd.f32 %v762_v48, %v538_v21  ;;  %2526 = vmatprep.subr.bf16.mxu1 %v2525_v15  ;;  %2036 = vmatprep.mubr.f32.mxu1 %v4722_v25  ;;  %v4078_v15 = vpop.permute.xlu0 %1327 }
 0x123   :  { %v1216_v62 = vadd.f32 %v3328_v47, %v1128_v49  ;;  %v842_v54 = vadd.f32 %v778_v4, %v554_v61 }
 0x124   :  { %v1264_v32 = vmax.f32 %v1200_v38, 0.0  ;;  %v1114_v6 = vadd.f32 %v1050_v45, %v826_v44  ;;  %2440 = vmatmul.mubr.msk.f32.gmra.mrb[46].mxu0 %vm1340_vm0, %v3565_v28 }
 0x125   :  { %v1280_v57 = vmax.f32 %v1216_v62, 0.0  ;;  %v1130_v11 = vadd.f32 %v1066_v27, %v842_v54  ;;  %2448 = vmatmul.mubr.msk.f32.gmra.mrb[46].mxu1 %vm1340_vm0, %v3565_v28  ;;  %2107 = vmatprep.mubr.f32.mxu0 %v4722_v25 }
 0x126   :  { %v1202_v22 = vadd.f32 %v3348_v42, %v1114_v6  ;;  %2220 = vmatprep.mubr.f32.mxu1 %v4722_v25 }
 0x127   :  { %v2519_v5 = vpack.c.bf16 %v1280_v57, %v1264_v32  ;;  %v1218_v12 = vadd.f32 %v3328_v47, %v1130_v11  ;;  %v3997_v47 = vpop.permute.xlu1 %1302 }
 0x128   :  { %v1266_v60 = vmax.f32 %v1202_v22, 0.0 }
 0x129   :  { %2520 = vmatpush1.bf16.msra.mxu0 %v2519_v5  ;;  %v1282_v20 = vmax.f32 %v1218_v12, 0.0 }
 0x12b   :  { %v2527_v31 = vpack.c.bf16 %v1282_v20, %v1266_v60  ;;  %v4027_v43 = vpop.permute.xlu1 %1312 }
 0x12c   :  { %2449 = vmatmul.mubr.msk.f32.vlgmr.msra.gmra.mrb[48].mxu0 %vm1340_vm0, %v2547_v13 }
 0x12d   :  { %2528 = vmatpush1.bf16.msra.mxu1 %v2527_v31  ;;  %2113 = vmatprep.mubr.f32.mxu0 %v4722_v25 }
 0x12f   :  { %v4060_v36 = vpop.permute.xlu1 %1322 }
 0x130   :  { %2457 = vmatmul.mubr.msk.f32.vlgmr.msra.gmra.mrb[48].mxu1 %vm1340_vm0, %v2547_v13  ;;  %2450 = vmatmul.mubr.msk.f32.gmra.mrb[50].mxu0 %vm1340_vm0, %v3412_v39  ;;  %v4114_v13 = vpop.permute.xlu0 %1337 }
 0x131   :  { %2226 = vmatprep.mubr.f32.mxu1 %v4722_v25  ;;  %2119 = vmatprep.mubr.f32.mxu0 %v4722_v25 }
 0x133   :  { %v4099_v6 = vpop.permute.xlu1 %1332 }
 0x134   :  { %2458 = vmatmul.mubr.msk.f32.gmra.mrb[50].mxu1 %vm1340_vm0, %v3412_v39  ;;  %2451 = vmatmul.mubr.msk.f32.gmra.mrb[52].mxu0 %vm1340_vm0, %v3437_v58 }
 0x135   :  { %2232 = vmatprep.mubr.f32.mxu1 %v4722_v25  ;;  %2125 = vmatprep.mubr.f32.mxu0 %v4722_v25 }
 0x138   :  { %2459 = vmatmul.mubr.msk.f32.gmra.mrb[52].mxu1 %vm1340_vm0, %v3437_v58  ;;  %2452 = vmatmul.mubr.msk.f32.gmra.mrb[54].mxu0 %vm1340_vm0, %v3463_v34 }
 0x139   :  { %2238 = vmatprep.mubr.f32.mxu1 %v4722_v25  ;;  %2131 = vmatprep.mubr.f32.mxu0 %v4722_v25 }
 0x13c   :  { %2460 = vmatmul.mubr.msk.f32.gmra.mrb[54].mxu1 %vm1340_vm0, %v3463_v34  ;;  %2453 = vmatmul.mubr.msk.f32.gmra.mrb[56].mxu0 %vm1340_vm0, %v3490_v40 }
 0x13d   :  { %2244 = vmatprep.mubr.f32.mxu1 %v4722_v25  ;;  %2137 = vmatprep.mubr.f32.mxu0 %v4722_v25 }
 0x140   :  { %2461 = vmatmul.mubr.msk.f32.gmra.mrb[56].mxu1 %vm1340_vm0, %v3490_v40  ;;  %2454 = vmatmul.mubr.msk.f32.gmra.mrb[58].mxu0 %vm1340_vm0, %v3519_v55 }
 0x141   :  { %2250 = vmatprep.mubr.f32.mxu1 %v4722_v25  ;;  %2143 = vmatprep.mubr.f32.mxu0 %v4722_v25 }
 0x144   :  { %2462 = vmatmul.mubr.msk.f32.gmra.mrb[58].mxu1 %vm1340_vm0, %v3519_v55  ;;  %2455 = vmatmul.mubr.msk.f32.gmra.mrb[60].mxu0 %vm1340_vm0, %v3541_v52 }
 0x145   :  { %2256 = vmatprep.mubr.f32.mxu1 %v4722_v25  ;;  %2149 = vmatprep.mubr.f32.mxu0 %v4722_v25 }
 0x148   :  { %2463 = vmatmul.mubr.msk.f32.gmra.mrb[60].mxu1 %vm1340_vm0, %v3541_v52  ;;  %2456 = vmatmul.mubr.msk.f32.gmra.mrb[62].mxu0 %vm1340_vm0, %v3565_v28 }
 0x149   :  { %2262 = vmatprep.mubr.f32.mxu1 %v4722_v25 }
 0x14c   :  { %2464 = vmatmul.mubr.msk.f32.gmra.mrb[62].mxu1 %vm1340_vm0, %v3565_v28 }
 0x197   :  { %v1431_v42 = vpop.f32.mrb[0].mxu0 }
 0x198   :  { %v1544_v39 = vpop.f32.mrb[0].mxu1  ;;  %v1432_v58 = vadd.f32 %v1431_v42, %v3997_v47  ;;  %v1433_v40 = vpop.f32.mrb[1].mxu0 }
 0x199   :  { %v1545_v34 = vadd.f32 %v1544_v39, %v3997_v47  ;;  %v1546_v55 = vpop.f32.mrb[1].mxu1  ;;  %v1434_v52 = vadd.f32 %v1433_v40, %v3997_v47 }
 0x19a   :  { %v1547_v37 = vadd.f32 %v1546_v55, %v3997_v47  ;;  %2269 = vst [vmem:[%s4530_s5] sm:$0xff] %v1432_v58 }
 0x19b   :  { %2271 = vst [vmem:[%s4530_s5 + $0x10] sm:$0xff] %v1545_v34  ;;  %2270 = vst [vmem:[%s4530_s5 + $0x8] sm:$0xff] %v1434_v52  ;;  %v1437_v25 = vpop.f32.mrb[2].mxu0 }
 0x19c   :  { %2272 = vst [vmem:[%s4530_s5 + $0x18] sm:$0xff] %v1547_v37  ;;  %v1550_v28 = vpop.f32.mrb[2].mxu1  ;;  %v1438_v56 = vadd.f32 %v1437_v25, %v4003_v9  ;;  %v1439_v10 = vpop.f32.mrb[3].mxu0 }
 0x19d   :  { %v1551_v50 = vadd.f32 %v1550_v28, %v4003_v9  ;;  %v1552_v18 = vpop.f32.mrb[3].mxu1  ;;  %v1440_v35 = vadd.f32 %v1439_v10, %v4003_v9 }
 0x19e   :  { %v1553_v53 = vadd.f32 %v1552_v18, %v4003_v9  ;;  %2285 = vst [vmem:[%s4530_s5 + $0x80] sm:$0xff] %v1438_v56 }
 0x19f   :  { %2287 = vst [vmem:[%s4530_s5 + $0x90] sm:$0xff] %v1551_v50  ;;  %2286 = vst [vmem:[%s4530_s5 + $0x88] sm:$0xff] %v1440_v35  ;;  %v1443_v59 = vpop.f32.mrb[4].mxu0 }
 0x1a0   :  { %2288 = vst [vmem:[%s4530_s5 + $0x98] sm:$0xff] %v1553_v53  ;;  %v1444_v19 = vadd.f32 %v1443_v59, %v4027_v43  ;;  %v1556_v51 = vpop.f32.mrb[4].mxu1  ;;  %v1445_v0 = vpop.f32.mrb[5].mxu0 }
 0x1a1   :  { %v1557_v14 = vadd.f32 %v1556_v51, %v4027_v43  ;;  %v1446_v8 = vadd.f32 %v1445_v0, %v4027_v43  ;;  %v1558_v24 = vpop.f32.mrb[5].mxu1 }
 0x1a2   :  { %2301 = vst [vmem:[%s4530_s5 + $0x100] sm:$0xff] %v1444_v19  ;;  %v1559_v41 = vadd.f32 %v1558_v24, %v4027_v43 }
 0x1a3   :  { %2303 = vst [vmem:[%s4530_s5 + $0x110] sm:$0xff] %v1557_v14  ;;  %2302 = vst [vmem:[%s4530_s5 + $0x108] sm:$0xff] %v1446_v8  ;;  %v1449_v2 = vpop.f32.mrb[6].mxu0 }
 0x1a4   :  { %2304 = vst [vmem:[%s4530_s5 + $0x118] sm:$0xff] %v1559_v41  ;;  %v1450_v7 = vadd.f32 %v1449_v2, %v4042_v29  ;;  %v1562_v30 = vpop.f32.mrb[6].mxu1  ;;  %v1451_v46 = vpop.f32.mrb[7].mxu0 }
 0x1a5   :  { %v1563_v33 = vadd.f32 %v1562_v30, %v4042_v29  ;;  %v1452_v63 = vadd.f32 %v1451_v46, %v4042_v29  ;;  %v1564_v3 = vpop.f32.mrb[7].mxu1 }
 0x1a6   :  { %2317 = vst [vmem:[%s4530_s5 + $0x180] sm:$0xff] %v1450_v7  ;;  %v1565_v26 = vadd.f32 %v1564_v3, %v4042_v29 }
 0x1a7   :  { %2319 = vst [vmem:[%s4530_s5 + $0x190] sm:$0xff] %v1563_v33  ;;  %2318 = vst [vmem:[%s4530_s5 + $0x188] sm:$0xff] %v1452_v63  ;;  %v1455_v16 = vpop.f32.mrb[8].mxu0 }
 0x1a8   :  { %2320 = vst [vmem:[%s4530_s5 + $0x198] sm:$0xff] %v1565_v26  ;;  %v1456_v1 = vadd.f32 %v1455_v16, %v4060_v36  ;;  %v1568_v17 = vpop.f32.mrb[8].mxu1  ;;  %v1457_v48 = vpop.f32.mrb[9].mxu0 }
 0x1a9   :  { %v1569_v23 = vadd.f32 %v1568_v17, %v4060_v36  ;;  %v1458_v21 = vadd.f32 %v1457_v48, %v4060_v36  ;;  %v1570_v4 = vpop.f32.mrb[9].mxu1 }
 0x1aa   :  { %2333 = vst [vmem:[%s4530_s5 + $0x200] sm:$0xff] %v1456_v1  ;;  %v1571_v45 = vadd.f32 %v1570_v4, %v4060_v36 }
 0x1ab   :  { %2335 = vst [vmem:[%s4530_s5 + $0x210] sm:$0xff] %v1569_v23  ;;  %2334 = vst [vmem:[%s4530_s5 + $0x208] sm:$0xff] %v1458_v21 }
 0x1ac   :  { %2336 = vst [vmem:[%s4530_s5 + $0x218] sm:$0xff] %v1571_v45  ;;  %v1461_v49 = vpop.f32.mrb[10].mxu0  ;;  %v1574_v61 = vpop.f32.mrb[10].mxu1 }
 0x1ad   :  { %v1462_v27 = vadd.f32 %v1461_v49, %v4078_v15  ;;  %v1575_v38 = vadd.f32 %v1574_v61, %v4078_v15  ;;  %v1463_v44 = vpop.f32.mrb[11].mxu0  ;;  %v1576_v62 = vpop.f32.mrb[11].mxu1 }
 0x1ae   :  { %v1464_v54 = vadd.f32 %v1463_v44, %v4078_v15  ;;  %v1577_v32 = vadd.f32 %v1576_v62, %v4078_v15 }
 0x1af   :  { %2349 = vst [vmem:[%s4530_s5 + $0x280] sm:$0xff] %v1462_v27  ;;  %2351 = vst [vmem:[%s4530_s5 + $0x290] sm:$0xff] %v1575_v38 }
 0x1b0   :  { %2350 = vst [vmem:[%s4530_s5 + $0x288] sm:$0xff] %v1464_v54  ;;  %2352 = vst [vmem:[%s4530_s5 + $0x298] sm:$0xff] %v1577_v32  ;;  %v1467_v57 = vpop.f32.mrb[12].mxu0 }
 0x1b1   :  { %v1468_v11 = vadd.f32 %v1467_v57, %v4099_v6  ;;  %v1580_v22 = vpop.f32.mrb[12].mxu1  ;;  %v1469_v5 = vpop.f32.mrb[13].mxu0 }
 0x1b2   :  { %v1581_v12 = vadd.f32 %v1580_v22, %v4099_v6  ;;  %v1470_v60 = vadd.f32 %v1469_v5, %v4099_v6  ;;  %v1582_v20 = vpop.f32.mrb[13].mxu1 }
 0x1b3   :  { %2365 = vst [vmem:[%s4530_s5 + $0x300] sm:$0xff] %v1468_v11  ;;  %v1583_v31 = vadd.f32 %v1582_v20, %v4099_v6 }
 0x1b4   :  { %2367 = vst [vmem:[%s4530_s5 + $0x310] sm:$0xff] %v1581_v12  ;;  %2366 = vst [vmem:[%s4530_s5 + $0x308] sm:$0xff] %v1470_v60  ;;  %v1473_v42 = vpop.f32.mrb[14].mxu0 }
 0x1b5   :  { %2368 = vst [vmem:[%s4530_s5 + $0x318] sm:$0xff] %v1583_v31  ;;  %v1474_v39 = vadd.f32 %v1473_v42, %v4114_v13  ;;  %v1586_v58 = vpop.f32.mrb[14].mxu1  ;;  %v1475_v34 = vpop.f32.mrb[15].mxu0 }
 0x1b6   :  { %v1587_v40 = vadd.f32 %v1586_v58, %v4114_v13  ;;  %v1476_v55 = vadd.f32 %v1475_v34, %v4114_v13  ;;  %v1588_v52 = vpop.f32.mrb[15].mxu1 }
 0x1b7   :  { %2381 = vst [vmem:[%s4530_s5 + $0x380] sm:$0xff] %v1474_v39  ;;  %v1589_v37 = vadd.f32 %v1588_v52, %v4114_v13 }
 0x1b8   :  { %2383 = vst [vmem:[%s4530_s5 + $0x390] sm:$0xff] %v1587_v40  ;;  %2382 = vst [vmem:[%s4530_s5 + $0x388] sm:$0xff] %v1476_v55  ;;  %v1657_v25 = vpop.f32.mrb[16].mxu0 }
 0x1b9   :  { %2384 = vst [vmem:[%s4530_s5 + $0x398] sm:$0xff] %v1589_v37  ;;  %v1658_v28 = vadd.f32 %v1657_v25, %v3997_v47  ;;  %v1770_v56 = vpop.f32.mrb[16].mxu1  ;;  %v1659_v50 = vpop.f32.mrb[17].mxu0 }
 0x1ba   :  { %v1771_v10 = vadd.f32 %v1770_v56, %v3997_v47  ;;  %v1660_v18 = vadd.f32 %v1659_v50, %v3997_v47  ;;  %v1772_v35 = vpop.f32.mrb[17].mxu1 }
 0x1bb   :  { %2273 = vst [vmem:[%s4530_s5 + $0x20] sm:$0xff] %v1658_v28  ;;  %v1773_v53 = vadd.f32 %v1772_v35, %v3997_v47 }
 0x1bc   :  { %2275 = vst [vmem:[%s4530_s5 + $0x30] sm:$0xff] %v1771_v10  ;;  %2274 = vst [vmem:[%s4530_s5 + $0x28] sm:$0xff] %v1660_v18  ;;  %v1663_v59 = vpop.f32.mrb[18].mxu0 }
 0x1bd   :  { %2276 = vst [vmem:[%s4530_s5 + $0x38] sm:$0xff] %v1773_v53  ;;  %v1664_v19 = vadd.f32 %v1663_v59, %v4003_v9  ;;  %v1665_v0 = vpop.f32.mrb[19].mxu0 }
 0x1be   :  { %v1776_v51 = vpop.f32.mrb[18].mxu1  ;;  %v1666_v8 = vadd.f32 %v1665_v0, %v4003_v9 }
 0x1bf   :  { %v1777_v14 = vadd.f32 %v1776_v51, %v4003_v9  ;;  %v1778_v24 = vpop.f32.mrb[19].mxu1  ;;  %2289 = vst [vmem:[%s4530_s5 + $0xa0] sm:$0xff] %v1664_v19 }
 0x1c0   :  { %v1779_v41 = vadd.f32 %v1778_v24, %v4003_v9  ;;  %2290 = vst [vmem:[%s4530_s5 + $0xa8] sm:$0xff] %v1666_v8  ;;  %v1669_v2 = vpop.f32.mrb[20].mxu0 }
 0x1c1   :  { %2291 = vst [vmem:[%s4530_s5 + $0xb0] sm:$0xff] %v1777_v14  ;;  %v1670_v7 = vadd.f32 %v1669_v2, %v4027_v43  ;;  %v1671_v46 = vpop.f32.mrb[21].mxu0 }
 0x1c2   :  { %2292 = vst [vmem:[%s4530_s5 + $0xb8] sm:$0xff] %v1779_v41  ;;  %v1782_v30 = vpop.f32.mrb[20].mxu1  ;;  %v1672_v63 = vadd.f32 %v1671_v46, %v4027_v43 }
 0x1c3   :  { %v1783_v33 = vadd.f32 %v1782_v30, %v4027_v43  ;;  %v1784_v3 = vpop.f32.mrb[21].mxu1  ;;  %2305 = vst [vmem:[%s4530_s5 + $0x120] sm:$0xff] %v1670_v7 }
 0x1c4   :  { %v1785_v26 = vadd.f32 %v1784_v3, %v4027_v43  ;;  %2306 = vst [vmem:[%s4530_s5 + $0x128] sm:$0xff] %v1672_v63 }
 0x1c5   :  { %2307 = vst [vmem:[%s4530_s5 + $0x130] sm:$0xff] %v1783_v33  ;;  %v1675_v16 = vpop.f32.mrb[22].mxu0 }
 0x1c6   :  { %2308 = vst [vmem:[%s4530_s5 + $0x138] sm:$0xff] %v1785_v26  ;;  %v1676_v1 = vadd.f32 %v1675_v16, %v4042_v29  ;;  %v1788_v17 = vpop.f32.mrb[22].mxu1  ;;  %v1677_v48 = vpop.f32.mrb[23].mxu0 }
 0x1c7   :  { %v1789_v23 = vadd.f32 %v1788_v17, %v4042_v29  ;;  %v1678_v21 = vadd.f32 %v1677_v48, %v4042_v29  ;;  %v1790_v4 = vpop.f32.mrb[23].mxu1 }
 0x1c8   :  { %2321 = vst [vmem:[%s4530_s5 + $0x1a0] sm:$0xff] %v1676_v1  ;;  %v1791_v45 = vadd.f32 %v1790_v4, %v4042_v29 }
 0x1c9   :  { %2323 = vst [vmem:[%s4530_s5 + $0x1b0] sm:$0xff] %v1789_v23  ;;  %2322 = vst [vmem:[%s4530_s5 + $0x1a8] sm:$0xff] %v1678_v21  ;;  %v1681_v49 = vpop.f32.mrb[24].mxu0 }
 0x1ca   :  { %2324 = vst [vmem:[%s4530_s5 + $0x1b8] sm:$0xff] %v1791_v45  ;;  %v1682_v61 = vadd.f32 %v1681_v49, %v4060_v36  ;;  %v1794_v27 = vpop.f32.mrb[24].mxu1  ;;  %v1683_v38 = vpop.f32.mrb[25].mxu0 }
 0x1cb   :  { %v1795_v44 = vadd.f32 %v1794_v27, %v4060_v36  ;;  %v1684_v62 = vadd.f32 %v1683_v38, %v4060_v36  ;;  %v1796_v54 = vpop.f32.mrb[25].mxu1 }
 0x1cc   :  { %2337 = vst [vmem:[%s4530_s5 + $0x220] sm:$0xff] %v1682_v61  ;;  %v1797_v32 = vadd.f32 %v1796_v54, %v4060_v36 }
 0x1cd   :  { %2339 = vst [vmem:[%s4530_s5 + $0x230] sm:$0xff] %v1795_v44  ;;  %2338 = vst [vmem:[%s4530_s5 + $0x228] sm:$0xff] %v1684_v62  ;;  %v1687_v57 = vpop.f32.mrb[26].mxu0 }
 0x1ce   :  { %2340 = vst [vmem:[%s4530_s5 + $0x238] sm:$0xff] %v1797_v32  ;;  %v1688_v11 = vadd.f32 %v1687_v57, %v4078_v15  ;;  %v1800_v22 = vpop.f32.mrb[26].mxu1  ;;  %v1689_v5 = vpop.f32.mrb[27].mxu0 }
 0x1cf   :  { %v1801_v12 = vadd.f32 %v1800_v22, %v4078_v15  ;;  %v1690_v60 = vadd.f32 %v1689_v5, %v4078_v15  ;;  %v1802_v20 = vpop.f32.mrb[27].mxu1 }
 0x1d0   :  { %2353 = vst [vmem:[%s4530_s5 + $0x2a0] sm:$0xff] %v1688_v11  ;;  %v1803_v31 = vadd.f32 %v1802_v20, %v4078_v15 }
 0x1d1   :  { %2355 = vst [vmem:[%s4530_s5 + $0x2b0] sm:$0xff] %v1801_v12  ;;  %2354 = vst [vmem:[%s4530_s5 + $0x2a8] sm:$0xff] %v1690_v60  ;;  %v1693_v42 = vpop.f32.mrb[28].mxu0 }
 0x1d2   :  { %2356 = vst [vmem:[%s4530_s5 + $0x2b8] sm:$0xff] %v1803_v31  ;;  %v1694_v39 = vadd.f32 %v1693_v42, %v4099_v6  ;;  %v1806_v58 = vpop.f32.mrb[28].mxu1  ;;  %v1695_v34 = vpop.f32.mrb[29].mxu0 }
 0x1d3   :  { %v1807_v40 = vadd.f32 %v1806_v58, %v4099_v6  ;;  %v1696_v55 = vadd.f32 %v1695_v34, %v4099_v6  ;;  %v1808_v52 = vpop.f32.mrb[29].mxu1 }
 0x1d4   :  { %2369 = vst [vmem:[%s4530_s5 + $0x320] sm:$0xff] %v1694_v39  ;;  %v1809_v37 = vadd.f32 %v1808_v52, %v4099_v6 }
 0x1d5   :  { %2371 = vst [vmem:[%s4530_s5 + $0x330] sm:$0xff] %v1807_v40  ;;  %2370 = vst [vmem:[%s4530_s5 + $0x328] sm:$0xff] %v1696_v55  ;;  %v1699_v25 = vpop.f32.mrb[30].mxu0 }
 0x1d6   :  { %2372 = vst [vmem:[%s4530_s5 + $0x338] sm:$0xff] %v1809_v37  ;;  %v1700_v28 = vadd.f32 %v1699_v25, %v4114_v13  ;;  %v1812_v56 = vpop.f32.mrb[30].mxu1  ;;  %v1701_v50 = vpop.f32.mrb[31].mxu0 }
 0x1d7   :  { %v1813_v10 = vadd.f32 %v1812_v56, %v4114_v13  ;;  %v1702_v18 = vadd.f32 %v1701_v50, %v4114_v13  ;;  %v1814_v35 = vpop.f32.mrb[31].mxu1 }
 0x1d8   :  { %2385 = vst [vmem:[%s4530_s5 + $0x3a0] sm:$0xff] %v1700_v28  ;;  %v1815_v53 = vadd.f32 %v1814_v35, %v4114_v13 }
 0x1d9   :  { %2387 = vst [vmem:[%s4530_s5 + $0x3b0] sm:$0xff] %v1813_v10  ;;  %2386 = vst [vmem:[%s4530_s5 + $0x3a8] sm:$0xff] %v1702_v18  ;;  %v1883_v59 = vpop.f32.mrb[32].mxu0 }
 0x1da   :  { %2388 = vst [vmem:[%s4530_s5 + $0x3b8] sm:$0xff] %v1815_v53  ;;  %v1884_v19 = vadd.f32 %v1883_v59, %v3997_v47  ;;  %v1996_v51 = vpop.f32.mrb[32].mxu1  ;;  %v1885_v0 = vpop.f32.mrb[33].mxu0 }
 0x1db   :  { %v1997_v14 = vadd.f32 %v1996_v51, %v3997_v47  ;;  %v1886_v8 = vadd.f32 %v1885_v0, %v3997_v47  ;;  %v1998_v24 = vpop.f32.mrb[33].mxu1 }
 0x1dc   :  { %2277 = vst [vmem:[%s4530_s5 + $0x40] sm:$0xff] %v1884_v19  ;;  %v1999_v41 = vadd.f32 %v1998_v24, %v3997_v47 }
 0x1dd   :  { %2279 = vst [vmem:[%s4530_s5 + $0x50] sm:$0xff] %v1997_v14  ;;  %2278 = vst [vmem:[%s4530_s5 + $0x48] sm:$0xff] %v1886_v8  ;;  %v1889_v2 = vpop.f32.mrb[34].mxu0 }
 0x1de   :  { %2280 = vst [vmem:[%s4530_s5 + $0x58] sm:$0xff] %v1999_v41  ;;  %v1890_v7 = vadd.f32 %v1889_v2, %v4003_v9  ;;  %v2002_v30 = vpop.f32.mrb[34].mxu1  ;;  %v1891_v46 = vpop.f32.mrb[35].mxu0 }
 0x1df   :  { %v2003_v33 = vadd.f32 %v2002_v30, %v4003_v9  ;;  %v1892_v63 = vadd.f32 %v1891_v46, %v4003_v9  ;;  %v2004_v3 = vpop.f32.mrb[35].mxu1 }
 0x1e0   :  { %2293 = vst [vmem:[%s4530_s5 + $0xc0] sm:$0xff] %v1890_v7  ;;  %v2005_v26 = vadd.f32 %v2004_v3, %v4003_v9 }
 0x1e1   :  { %2295 = vst [vmem:[%s4530_s5 + $0xd0] sm:$0xff] %v2003_v33  ;;  %2294 = vst [vmem:[%s4530_s5 + $0xc8] sm:$0xff] %v1892_v63 }
 0x1e2   :  { %2296 = vst [vmem:[%s4530_s5 + $0xd8] sm:$0xff] %v2005_v26  ;;  %v1895_v16 = vpop.f32.mrb[36].mxu0 }
 0x1e3   :  { %v2008_v1 = vpop.f32.mrb[36].mxu1  ;;  %v1896_v17 = vadd.f32 %v1895_v16, %v4027_v43  ;;  %v1897_v23 = vpop.f32.mrb[37].mxu0 }
 0x1e4   :  { %v2009_v48 = vadd.f32 %v2008_v1, %v4027_v43  ;;  %v2010_v21 = vpop.f32.mrb[37].mxu1  ;;  %v1898_v4 = vadd.f32 %v1897_v23, %v4027_v43 }
 0x1e5   :  { %v2011_v45 = vadd.f32 %v2010_v21, %v4027_v43  ;;  %2309 = vst [vmem:[%s4530_s5 + $0x140] sm:$0xff] %v1896_v17 }
 0x1e6   :  { %2311 = vst [vmem:[%s4530_s5 + $0x150] sm:$0xff] %v2009_v48  ;;  %2310 = vst [vmem:[%s4530_s5 + $0x148] sm:$0xff] %v1898_v4  ;;  %v1901_v49 = vpop.f32.mrb[38].mxu0 }
 0x1e7   :  { %2312 = vst [vmem:[%s4530_s5 + $0x158] sm:$0xff] %v2011_v45  ;;  %v1902_v61 = vadd.f32 %v1901_v49, %v4042_v29  ;;  %v1903_v38 = vpop.f32.mrb[39].mxu0 }
 0x1e8   :  { %v2014_v27 = vpop.f32.mrb[38].mxu1  ;;  %v1904_v62 = vadd.f32 %v1903_v38, %v4042_v29 }
 0x1e9   :  { %v2015_v44 = vadd.f32 %v2014_v27, %v4042_v29  ;;  %v2016_v54 = vpop.f32.mrb[39].mxu1  ;;  %2325 = vst [vmem:[%s4530_s5 + $0x1c0] sm:$0xff] %v1902_v61 }
 0x1ea   :  { %v2017_v32 = vadd.f32 %v2016_v54, %v4042_v29  ;;  %2326 = vst [vmem:[%s4530_s5 + $0x1c8] sm:$0xff] %v1904_v62  ;;  %v1907_v57 = vpop.f32.mrb[40].mxu0 }
 0x1eb   :  { %2327 = vst [vmem:[%s4530_s5 + $0x1d0] sm:$0xff] %v2015_v44  ;;  %v1908_v11 = vadd.f32 %v1907_v57, %v4060_v36  ;;  %v1909_v5 = vpop.f32.mrb[41].mxu0 }
 0x1ec   :  { %2328 = vst [vmem:[%s4530_s5 + $0x1d8] sm:$0xff] %v2017_v32  ;;  %v2020_v22 = vpop.f32.mrb[40].mxu1  ;;  %v1910_v60 = vadd.f32 %v1909_v5, %v4060_v36 }
 0x1ed   :  { %v2021_v12 = vadd.f32 %v2020_v22, %v4060_v36  ;;  %v2022_v20 = vpop.f32.mrb[41].mxu1  ;;  %2341 = vst [vmem:[%s4530_s5 + $0x240] sm:$0xff] %v1908_v11 }
 0x1ee   :  { %v2023_v31 = vadd.f32 %v2022_v20, %v4060_v36  ;;  %2342 = vst [vmem:[%s4530_s5 + $0x248] sm:$0xff] %v1910_v60 }
 0x1ef   :  { %2343 = vst [vmem:[%s4530_s5 + $0x250] sm:$0xff] %v2021_v12  ;;  %v1913_v42 = vpop.f32.mrb[42].mxu0 }
 0x1f0   :  { %2344 = vst [vmem:[%s4530_s5 + $0x258] sm:$0xff] %v2023_v31  ;;  %v1914_v39 = vadd.f32 %v1913_v42, %v4078_v15  ;;  %v2026_v58 = vpop.f32.mrb[42].mxu1  ;;  %v1915_v34 = vpop.f32.mrb[43].mxu0 }
 0x1f1   :  { %v2027_v40 = vadd.f32 %v2026_v58, %v4078_v15  ;;  %v1916_v55 = vadd.f32 %v1915_v34, %v4078_v15  ;;  %v2028_v52 = vpop.f32.mrb[43].mxu1 }
 0x1f2   :  { %2357 = vst [vmem:[%s4530_s5 + $0x2c0] sm:$0xff] %v1914_v39  ;;  %v2029_v37 = vadd.f32 %v2028_v52, %v4078_v15 }
 0x1f3   :  { %2359 = vst [vmem:[%s4530_s5 + $0x2d0] sm:$0xff] %v2027_v40  ;;  %2358 = vst [vmem:[%s4530_s5 + $0x2c8] sm:$0xff] %v1916_v55  ;;  %v1919_v25 = vpop.f32.mrb[44].mxu0 }
 0x1f4   :  { %2360 = vst [vmem:[%s4530_s5 + $0x2d8] sm:$0xff] %v2029_v37  ;;  %v1920_v28 = vadd.f32 %v1919_v25, %v4099_v6  ;;  %v2032_v56 = vpop.f32.mrb[44].mxu1  ;;  %v1921_v50 = vpop.f32.mrb[45].mxu0 }
 0x1f5   :  { %v2033_v10 = vadd.f32 %v2032_v56, %v4099_v6  ;;  %v1922_v18 = vadd.f32 %v1921_v50, %v4099_v6  ;;  %v2034_v35 = vpop.f32.mrb[45].mxu1 }
 0x1f6   :  { %2373 = vst [vmem:[%s4530_s5 + $0x340] sm:$0xff] %v1920_v28  ;;  %v2035_v53 = vadd.f32 %v2034_v35, %v4099_v6 }
 0x1f7   :  { %2375 = vst [vmem:[%s4530_s5 + $0x350] sm:$0xff] %v2033_v10  ;;  %2374 = vst [vmem:[%s4530_s5 + $0x348] sm:$0xff] %v1922_v18  ;;  %v1925_v59 = vpop.f32.mrb[46].mxu0 }
 0x1f8   :  { %2376 = vst [vmem:[%s4530_s5 + $0x358] sm:$0xff] %v2035_v53  ;;  %v1926_v19 = vadd.f32 %v1925_v59, %v4114_v13  ;;  %v2038_v51 = vpop.f32.mrb[46].mxu1  ;;  %v1927_v0 = vpop.f32.mrb[47].mxu0 }
 0x1f9   :  { %v2039_v14 = vadd.f32 %v2038_v51, %v4114_v13  ;;  %v1928_v8 = vadd.f32 %v1927_v0, %v4114_v13  ;;  %v2040_v24 = vpop.f32.mrb[47].mxu1 }
 0x1fa   :  { %2389 = vst [vmem:[%s4530_s5 + $0x3c0] sm:$0xff] %v1926_v19  ;;  %v2041_v41 = vadd.f32 %v2040_v24, %v4114_v13 }
 0x1fb   :  { %2391 = vst [vmem:[%s4530_s5 + $0x3d0] sm:$0xff] %v2039_v14  ;;  %2390 = vst [vmem:[%s4530_s5 + $0x3c8] sm:$0xff] %v1928_v8 }
 0x1fc   :  { %2392 = vst [vmem:[%s4530_s5 + $0x3d8] sm:$0xff] %v2041_v41 }
 0x1ff   :  { %v2109_v2 = vpop.f32.mrb[48].mxu0 }
 0x200   :  { %v2110_v7 = vadd.f32 %v2109_v2, %v3997_v47  ;;  %v2111_v30 = vpop.f32.mrb[49].mxu0 }
 0x201   :  { %v2112_v46 = vadd.f32 %v2111_v30, %v3997_v47 }
 0x202   :  { %2281 = vst [vmem:[%s4530_s5 + $0x60] sm:$0xff] %v2110_v7 }
 0x203   :  { %v2222_v33 = vpop.f32.mrb[48].mxu1  ;;  %2282 = vst [vmem:[%s4530_s5 + $0x68] sm:$0xff] %v2112_v46  ;;  %v2115_v63 = vpop.f32.mrb[50].mxu0 }
 0x204   :  { %v2223_v3 = vadd.f32 %v2222_v33, %v3997_v47  ;;  %v2224_v26 = vpop.f32.mrb[49].mxu1  ;;  %v2116_v16 = vadd.f32 %v2115_v63, %v4003_v9  ;;  %v2117_v1 = vpop.f32.mrb[51].mxu0 }
 0x205   :  { %v2225_v17 = vadd.f32 %v2224_v26, %v3997_v47  ;;  %v2118_v48 = vadd.f32 %v2117_v1, %v4003_v9 }
 0x206   :  { %2283 = vst [vmem:[%s4530_s5 + $0x70] sm:$0xff] %v2223_v3  ;;  %2297 = vst [vmem:[%s4530_s5 + $0xe0] sm:$0xff] %v2116_v16 }
 0x207   :  { %2284 = vst [vmem:[%s4530_s5 + $0x78] sm:$0xff] %v2225_v17  ;;  %v2228_v23 = vpop.f32.mrb[50].mxu1  ;;  %2298 = vst [vmem:[%s4530_s5 + $0xe8] sm:$0xff] %v2118_v48  ;;  %v2121_v47 = vpop.f32.mrb[52].mxu0 }
 0x208   :  { %v2229_v21 = vadd.f32 %v2228_v23, %v4003_v9  ;;  %v2230_v4 = vpop.f32.mrb[51].mxu1  ;;  %v2122_v45 = vadd.f32 %v2121_v47, %v4027_v43  ;;  %v2123_v49 = vpop.f32.mrb[53].mxu0 }
 0x209   :  { %v2231_v61 = vadd.f32 %v2230_v4, %v4003_v9  ;;  %v2124_v27 = vadd.f32 %v2123_v49, %v4027_v43 }
 0x20a   :  { %2299 = vst [vmem:[%s4530_s5 + $0xf0] sm:$0xff] %v2229_v21  ;;  %2313 = vst [vmem:[%s4530_s5 + $0x160] sm:$0xff] %v2122_v45 }
 0x20b   :  { %2300 = vst [vmem:[%s4530_s5 + $0xf8] sm:$0xff] %v2231_v61  ;;  %v2234_v38 = vpop.f32.mrb[52].mxu1  ;;  %2314 = vst [vmem:[%s4530_s5 + $0x168] sm:$0xff] %v2124_v27  ;;  %v2127_v9 = vpop.f32.mrb[54].mxu0 }
 0x20c   :  { %v2235_v44 = vadd.f32 %v2234_v38, %v4027_v43  ;;  %v2236_v62 = vpop.f32.mrb[53].mxu1  ;;  %v2128_v54 = vadd.f32 %v2127_v9, %v4042_v29  ;;  %v2129_v32 = vpop.f32.mrb[55].mxu0 }
 0x20d   :  { %v2237_v57 = vadd.f32 %v2236_v62, %v4027_v43  ;;  %v2130_v11 = vadd.f32 %v2129_v32, %v4042_v29 }
 0x20e   :  { %2315 = vst [vmem:[%s4530_s5 + $0x170] sm:$0xff] %v2235_v44  ;;  %2329 = vst [vmem:[%s4530_s5 + $0x1e0] sm:$0xff] %v2128_v54 }
 0x20f   :  { %2316 = vst [vmem:[%s4530_s5 + $0x178] sm:$0xff] %v2237_v57  ;;  %v2240_v22 = vpop.f32.mrb[54].mxu1  ;;  %2330 = vst [vmem:[%s4530_s5 + $0x1e8] sm:$0xff] %v2130_v11  ;;  %v2133_v43 = vpop.f32.mrb[56].mxu0 }
 0x210   :  { %v2241_v5 = vadd.f32 %v2240_v22, %v4042_v29  ;;  %v2242_v12 = vpop.f32.mrb[55].mxu1  ;;  %v2134_v60 = vadd.f32 %v2133_v43, %v4060_v36  ;;  %v2135_v20 = vpop.f32.mrb[57].mxu0 }
 0x211   :  { %v2243_v31 = vadd.f32 %v2242_v12, %v4042_v29  ;;  %v2136_v42 = vadd.f32 %v2135_v20, %v4060_v36 }
 0x212   :  { %2331 = vst [vmem:[%s4530_s5 + $0x1f0] sm:$0xff] %v2241_v5  ;;  %2345 = vst [vmem:[%s4530_s5 + $0x260] sm:$0xff] %v2134_v60 }
 0x213   :  { %2332 = vst [vmem:[%s4530_s5 + $0x1f8] sm:$0xff] %v2243_v31  ;;  %v2246_v39 = vpop.f32.mrb[56].mxu1  ;;  %2346 = vst [vmem:[%s4530_s5 + $0x268] sm:$0xff] %v2136_v42  ;;  %v2139_v29 = vpop.f32.mrb[58].mxu0 }
 0x214   :  { %v2247_v58 = vadd.f32 %v2246_v39, %v4060_v36  ;;  %v2248_v34 = vpop.f32.mrb[57].mxu1  ;;  %v2140_v40 = vadd.f32 %v2139_v29, %v4078_v15  ;;  %v2141_v55 = vpop.f32.mrb[59].mxu0 }
 0x215   :  { %v2249_v52 = vadd.f32 %v2248_v34, %v4060_v36  ;;  %v2142_v37 = vadd.f32 %v2141_v55, %v4078_v15 }
 0x216   :  { %2347 = vst [vmem:[%s4530_s5 + $0x270] sm:$0xff] %v2247_v58  ;;  %2361 = vst [vmem:[%s4530_s5 + $0x2e0] sm:$0xff] %v2140_v40 }
 0x217   :  { %2348 = vst [vmem:[%s4530_s5 + $0x278] sm:$0xff] %v2249_v52  ;;  %v2252_v25 = vpop.f32.mrb[58].mxu1  ;;  %2362 = vst [vmem:[%s4530_s5 + $0x2e8] sm:$0xff] %v2142_v37  ;;  %v2145_v36 = vpop.f32.mrb[60].mxu0 }
 0x218   :  { %v2253_v28 = vadd.f32 %v2252_v25, %v4078_v15  ;;  %v2254_v56 = vpop.f32.mrb[59].mxu1  ;;  %v2146_v50 = vadd.f32 %v2145_v36, %v4099_v6  ;;  %v2147_v10 = vpop.f32.mrb[61].mxu0 }
 0x219   :  { %v2255_v18 = vadd.f32 %v2254_v56, %v4078_v15  ;;  %v2148_v35 = vadd.f32 %v2147_v10, %v4099_v6 }
 0x21a   :  { %2363 = vst [vmem:[%s4530_s5 + $0x2f0] sm:$0xff] %v2253_v28  ;;  %2377 = vst [vmem:[%s4530_s5 + $0x360] sm:$0xff] %v2146_v50 }
 0x21b   :  { %2364 = vst [vmem:[%s4530_s5 + $0x2f8] sm:$0xff] %v2255_v18  ;;  %v2258_v53 = vpop.f32.mrb[60].mxu1  ;;  %2378 = vst [vmem:[%s4530_s5 + $0x368] sm:$0xff] %v2148_v35  ;;  %v2151_v15 = vpop.f32.mrb[62].mxu0 }
 0x21c   :  { %v2259_v59 = vadd.f32 %v2258_v53, %v4099_v6  ;;  %v2260_v19 = vpop.f32.mrb[61].mxu1  ;;  %v2152_v51 = vadd.f32 %v2151_v15, %v4114_v13  ;;  %v2153_v0 = vpop.f32.mrb[63].mxu0 }
 0x21d   :  { %v2261_v14 = vadd.f32 %v2260_v19, %v4099_v6  ;;  %v2154_v8 = vadd.f32 %v2153_v0, %v4114_v13 }
 0x21e   :  { %2379 = vst [vmem:[%s4530_s5 + $0x370] sm:$0xff] %v2259_v59  ;;  %2393 = vst [vmem:[%s4530_s5 + $0x3e0] sm:$0xff] %v2152_v51 }
 0x21f   :  { %2380 = vst [vmem:[%s4530_s5 + $0x378] sm:$0xff] %v2261_v14  ;;  %v2264_v24 = vpop.f32.mrb[62].mxu1  ;;  %2394 = vst [vmem:[%s4530_s5 + $0x3e8] sm:$0xff] %v2154_v8 }
 0x220   :  { %v2265_v6 = vadd.f32 %v2264_v24, %v4114_v13  ;;  %v2266_v41 = vpop.f32.mrb[63].mxu1 }
 0x221   :  { %v2267_v2 = vadd.f32 %v2266_v41, %v4114_v13 }
 0x222   :  { %2395 = vst [vmem:[%s4530_s5 + $0x3f0] sm:$0xff] %v2265_v6 }
 0x223   :  { %2396 = vst [vmem:[%s4530_s5 + $0x3f8] sm:$0xff] %v2267_v2 }

</bundles_post_ra>
